<compile_context>
chip_gen: v6e
topology: v6e:2x2x1
jax: 0.10.0
libtpu: 0.0.40
codegen_flags: <defaults>
</compile_context>

<pallas_src>
import jax
import jax.numpy as jnp
from jax.experimental import pallas as pl
from jax.experimental.pallas import tpu as pltpu


def add_conv1x1_kernel(w_ref, a_ref, b_ref, o_ref):
    # w_ref: (Cout, Cin)   a_ref, b_ref: (Cin, HW)   o_ref: (Cout, HW)
    s = a_ref[...] + b_ref[...]
    o_ref[...] = jnp.dot(
        w_ref[...], s, preferred_element_type=jnp.float32
    ).astype(o_ref.dtype)


def add_conv1x1(x335, x321, weight):
    """x335, x321: (N, Cin, H, W) float32; weight: (Cout, Cin, 1, 1) float32.

    Equivalent to Conv2d(Cin, Cout, 1, bias=False)(x335 + x321) in NCHW.
    """
    N, Cin, H, W = x335.shape
    Cout = weight.shape[0]
    HW = H * W

    # All of these are contiguous views (no data movement / no XLA transpose).
    a = x335.reshape(N, Cin, HW)
    b = x321.reshape(N, Cin, HW)
    w = weight.reshape(Cout, Cin)

    # Whole-array blocks: total VMEM footprint is ~1.6 MB for the module's
    # shapes (196x160x960), far below VMEM limits, so no tiling beyond the
    # batch grid axis. Per-step overhead of extra grid steps would dominate.
    out_flat = pl.pallas_call(
        add_conv1x1_kernel,
        out_shape=jax.ShapeDtypeStruct((N, Cout, HW), x335.dtype),
        grid=(N,),
        in_specs=[
            pl.BlockSpec((Cout, Cin), lambda n: (0, 0)),        # weight, resident
            pl.BlockSpec((None, Cin, HW), lambda n: (n, 0, 0)),  # a[n]
            pl.BlockSpec((None, Cin, HW), lambda n: (n, 0, 0)),  # b[n]
        ],
        out_specs=pl.BlockSpec((None, Cout, HW), lambda n: (n, 0, 0)),
        compiler_params=pltpu.CompilerParams(
            dimension_semantics=("parallel",),
        ),
    )(w, a, b)

    # (N, Cout, HW) -> (N, Cout, H, W): free reshape, already NCHW.
    return out_flat.reshape(N, Cout, H, W)


if __name__ == "__main__":
    key = jax.random.PRNGKey(0)
    k1, k2, k3 = jax.random.split(key, 3)

    # Shapes from the original module: x335/x321 (1,160,14,14), Conv2d(160,960,1)
    N, Cin, H, W = 1, 160, 14, 14
    Cout = 960

    x335 = jax.random.normal(k1, (N, Cin, H, W), dtype=jnp.float32)
    x321 = jax.random.normal(k2, (N, Cin, H, W), dtype=jnp.float32)
    weight = jax.random.normal(k3, (Cout, Cin, 1, 1), dtype=jnp.float32) * 0.05

    out = add_conv1x1(x335, x321, weight)
    out = jax.block_until_ready(out)

    # Reference: 1x1 conv over channels == einsum over C.
    ref = jnp.einsum("nchw,oc->nohw", x335 + x321, weight.reshape(Cout, Cin))
    assert out.shape == (N, Cout, H, W)
    assert jnp.allclose(out, ref, atol=1e-3, rtol=1e-3)

    print("KERNEL_OK")
</pallas_src>

<mosaic_0001>
module attributes {stable_mosaic.version = 11 : i64} {
  func.func @add_conv1x1_kernel(%arg0: i32, %arg1: memref<960x160xf32, #tpu.memory_space<vmem>>, %arg2: memref<1x160x196xf32, #tpu.memory_space<vmem>>, %arg3: memref<1x160x196xf32, #tpu.memory_space<vmem>>, %arg4: memref<1x960x196xf32, #tpu.memory_space<vmem>>) attributes {dimension_semantics = [#tpu.dimension_semantics<parallel>], iteration_bounds = array<i64: 1>, scalar_prefetch = 0 : i64, scratch_operands = 0 : i64, tpu.core_type = #tpu.core_type<tc>, window_params = [{pipeline_mode = #tpu.pipeline_mode<synchronous>, transform_indices = @transform_0, window_bounds = array<i64: 960, 160>}, {transform_indices = @transform_1, window_bounds = array<i64: 1, 160, 196>}, {transform_indices = @transform_2, window_bounds = array<i64: 1, 160, 196>}, {transform_indices = @transform_3, window_bounds = array<i64: 1, 960, 196>}]} {
    %c0 = arith.constant 0 : index
    %c0_0 = arith.constant 0 : index
    %c0_1 = arith.constant 0 : index
    %0 = vector.load %arg2[%c0, %c0_0, %c0_1] : memref<1x160x196xf32, #tpu.memory_space<vmem>>, vector<1x160x196xf32>
    %1 = vector.shape_cast %0 : vector<1x160x196xf32> to vector<160x196xf32>
    %c0_2 = arith.constant 0 : index
    %c0_3 = arith.constant 0 : index
    %c0_4 = arith.constant 0 : index
    %2 = vector.load %arg3[%c0_2, %c0_3, %c0_4] : memref<1x160x196xf32, #tpu.memory_space<vmem>>, vector<1x160x196xf32>
    %3 = vector.shape_cast %2 : vector<1x160x196xf32> to vector<160x196xf32>
    %4 = arith.addf %1, %3 : vector<160x196xf32>
    %c0_5 = arith.constant 0 : index
    %c0_6 = arith.constant 0 : index
    %5 = vector.load %arg1[%c0_5, %c0_6] : memref<960x160xf32, #tpu.memory_space<vmem>>, vector<960x160xf32>
    %cst = arith.constant dense<0.000000e+00> : vector<960x196xf32>
    %6 = tpu.matmul %5, %4, %cst {dimension_numbers = #tpu.dot_dimension_numbers<[1], [0], [0], [1], [0, 0, 1, 1], [], []>} : vector<960x160xf32>, vector<160x196xf32>, vector<960x196xf32> -> vector<960x196xf32>
    %c0_7 = arith.constant 0 : index
    %c0_8 = arith.constant 0 : index
    %c0_9 = arith.constant 0 : index
    %7 = vector.load %arg4[%c0_7, %c0_8, %c0_9] : memref<1x960x196xf32, #tpu.memory_space<vmem>>, vector<1x960x196xf32>
    %8 = vector.shape_cast %7 : vector<1x960x196xf32> to vector<960x196xf32>
    %9 = vector.shape_cast %6 : vector<960x196xf32> to vector<1x960x196xf32>
    tpu.vector_store %arg4[%c0_7, %c0_8, %c0_9], %9 {strides = array<i32>} : memref<1x960x196xf32, #tpu.memory_space<vmem>>, vector<1x960x196xf32>,
    return
  }
  func.func @transform_0(%arg0: i32) -> (i32, i32) {
    %c0_i32 = arith.constant 0 : i32
    %c0_i32_0 = arith.constant 0 : i32
    %c0_i32_1 = arith.constant 0 : i32
    return %c0_i32, %c0_i32_0 : i32, i32
  }
  func.func @transform_1(%arg0: i32) -> (i32, i32, i32) {
    %c0_i32 = arith.constant 0 : i32
    %c0_i32_0 = arith.constant 0 : i32
    %c0_i32_1 = arith.constant 0 : i32
    return %arg0, %c0_i32, %c0_i32_0 : i32, i32, i32
  }
  func.func @transform_2(%arg0: i32) -> (i32, i32, i32) {
    %c0_i32 = arith.constant 0 : i32
    %c0_i32_0 = arith.constant 0 : i32
    %c0_i32_1 = arith.constant 0 : i32
    return %arg0, %c0_i32, %c0_i32_0 : i32, i32, i32
  }
  func.func @transform_3(%arg0: i32) -> (i32, i32, i32) {
    %c0_i32 = arith.constant 0 : i32
    %c0_i32_0 = arith.constant 0 : i32
    %c0_i32_1 = arith.constant 0 : i32
    return %arg0, %c0_i32, %c0_i32_0 : i32, i32, i32
  }
}

</mosaic_0001>

<bundles_post_ra>
// kernel: tpu_custom_call.1
= control target key start
LH: loop header
LB: loop body
LE: loop exit
PB: predicated region body
PF: predicated region fallthrough
CT: control target
= control target key end

     0   :  { %vm374_vm0 = vcmask 261120   ;;  %vm1521_vm1 = vcmask 556032   ;;  %s3865_s1 = inlined_call_operand.vmem [shape: f32[1,160,196], index: 1, kind: input, shape index: {}]   ;;  %s3866_s2 = inlined_call_operand.vmem [shape: f32[1,160,196], index: 2, kind: input, shape index: {}]   ;;  %s3867_s0 = inlined_call_operand.vmem [shape: f32[960,160], index: 0, kind: input, shape index: {}]   ;;  %s3868_s3 = inlined_call_operand.vmem [shape: f32[1,960,196], index: 3, kind: output, shape index: {}]  }
   0x1   :  { %v45_v0 = vld [vmem:[%s3865_s1 + $0xf8] sm:$0xff]  ;;  %v44_v2 = vld [vmem:[%s3865_s1 + $0xf0] sm:$0xff]  ;;  %v43_v5 = vld [vmem:[%s3865_s1 + $0xe8] sm:$0xff] }
   0x2   :  { %v85_v1 = vld [vmem:[%s3866_s2 + $0xf8] sm:$0xff]  ;;  %v84_v4 = vld [vmem:[%s3866_s2 + $0xf0] sm:$0xff]  ;;  %v83_v6 = vld [vmem:[%s3866_s2 + $0xe8] sm:$0xff] }
   0x3   :  { %v125_v3 = vadd.f32 %v85_v1, %v45_v0  ;;  %v124_v7 = vadd.f32 %v84_v4, %v44_v2  ;;  %v123_v8 = vadd.f32 %v83_v6, %v43_v5  ;;  %v42_v9 = vld [vmem:[%s3865_s1 + $0xe0] sm:$0xff]  ;;  %v41_v11 = vld [vmem:[%s3865_s1 + $0xd8] sm:$0xff]  ;;  %v40_v14 = vld [vmem:[%s3865_s1 + $0xd0] sm:$0xff] }
   0x4   :  { %v82_v10 = vld [vmem:[%s3866_s2 + $0xe0] sm:$0xff]  ;;  %v81_v13 = vld [vmem:[%s3866_s2 + $0xd8] sm:$0xff]  ;;  %v80_v15 = vld [vmem:[%s3866_s2 + $0xd0] sm:$0xff] }
   0x5   :  { %735 = vmatprep.subr.mxu0 %v125_v3  ;;  %1885 = vmatprep.subr.mxu1 %v125_v3  ;;  %v122_v12 = vadd.f32 %v82_v10, %v42_v9  ;;  %v121_v16 = vadd.f32 %v81_v13, %v41_v11  ;;  %v120_v17 = vadd.f32 %v80_v15, %v40_v14  ;;  %v39_v18 = vld [vmem:[%s3865_s1 + $0xc8] sm:$0xff]  ;;  %v38_v20 = vld [vmem:[%s3865_s1 + $0xc0] sm:$0xff]  ;;  %v37_v23 = vld [vmem:[%s3865_s1 + $0xb8] sm:$0xff] }
   0x6   :  { %736 = vmatpush1.msra.mxu0 %v124_v7  ;;  %1905 = vmatpush1.msra.mxu1 %v124_v7  ;;  %v79_v19 = vld [vmem:[%s3866_s2 + $0xc8] sm:$0xff]  ;;  %v78_v22 = vld [vmem:[%s3866_s2 + $0xc0] sm:$0xff]  ;;  %v77_v24 = vld [vmem:[%s3866_s2 + $0xb8] sm:$0xff] }
   0x7   :  { %737 = vmatprep.subr.mxu0 %v123_v8  ;;  %1886 = vmatprep.subr.mxu1 %v123_v8  ;;  %v119_v21 = vadd.f32 %v79_v19, %v39_v18  ;;  %v118_v25 = vadd.f32 %v78_v22, %v38_v20  ;;  %v36_v26 = vld [vmem:[%s3865_s1 + $0xb0] sm:$0xff]  ;;  %v35_v28 = vld [vmem:[%s3865_s1 + $0xa8] sm:$0xff]  ;;  %v117_v29 = vadd.f32 %v77_v24, %v37_v23  ;;  %v34_v31 = vld [vmem:[%s3865_s1 + $0xa0] sm:$0xff] }
   0x8   :  { %738 = vmatpush1.msra.mxu0 %v122_v12  ;;  %1906 = vmatpush1.msra.mxu1 %v122_v12  ;;  %v76_v27 = vld [vmem:[%s3866_s2 + $0xb0] sm:$0xff]  ;;  %v75_v30 = vld [vmem:[%s3866_s2 + $0xa8] sm:$0xff]  ;;  %v74_v32 = vld [vmem:[%s3866_s2 + $0xa0] sm:$0xff] }
   0x9   :  { %739 = vmatprep.subr.mxu0 %v121_v16  ;;  %1887 = vmatprep.subr.mxu1 %v121_v16  ;;  %v116_v33 = vadd.f32 %v76_v27, %v36_v26  ;;  %v33_v34 = vld [vmem:[%s3865_s1 + $0x98] sm:$0xff]  ;;  %v115_v36 = vadd.f32 %v75_v30, %v35_v28  ;;  %v32_v37 = vld [vmem:[%s3865_s1 + $0x90] sm:$0xff]  ;;  %v114_v39 = vadd.f32 %v74_v32, %v34_v31  ;;  %v31_v40 = vld [vmem:[%s3865_s1 + $0x88] sm:$0xff] }
   0xa   :  { %740 = vmatpush1.msra.mxu0 %v120_v17  ;;  %1907 = vmatpush1.msra.mxu1 %v120_v17  ;;  %v73_v35 = vld [vmem:[%s3866_s2 + $0x98] sm:$0xff]  ;;  %v72_v38 = vld [vmem:[%s3866_s2 + $0x90] sm:$0xff]  ;;  %v71_v41 = vld [vmem:[%s3866_s2 + $0x88] sm:$0xff] }
   0xb   :  { %741 = vmatprep.subr.mxu0 %v119_v21  ;;  %1888 = vmatprep.subr.mxu1 %v119_v21  ;;  %v113_v42 = vadd.f32 %v73_v35, %v33_v34  ;;  %v30_v43 = vld [vmem:[%s3865_s1 + $0x80] sm:$0xff]  ;;  %v112_v45 = vadd.f32 %v72_v38, %v32_v37  ;;  %v29_v46 = vld [vmem:[%s3865_s1 + $0x78] sm:$0xff]  ;;  %v111_v48 = vadd.f32 %v71_v41, %v31_v40  ;;  %v28_v49 = vld [vmem:[%s3865_s1 + $0x70] sm:$0xff] }
   0xc   :  { %742 = vmatpush1.msra.mxu0 %v118_v25  ;;  %1908 = vmatpush1.msra.mxu1 %v118_v25  ;;  %v70_v44 = vld [vmem:[%s3866_s2 + $0x80] sm:$0xff]  ;;  %v69_v47 = vld [vmem:[%s3866_s2 + $0x78] sm:$0xff]  ;;  %v68_v50 = vld [vmem:[%s3866_s2 + $0x70] sm:$0xff] }
   0xd   :  { %743 = vmatprep.subr.mxu0 %v117_v29  ;;  %1889 = vmatprep.subr.mxu1 %v117_v29  ;;  %v110_v51 = vadd.f32 %v70_v44, %v30_v43  ;;  %v27_v52 = vld [vmem:[%s3865_s1 + $0x68] sm:$0xff]  ;;  %v109_v54 = vadd.f32 %v69_v47, %v29_v46  ;;  %v26_v55 = vld [vmem:[%s3865_s1 + $0x60] sm:$0xff]  ;;  %v108_v57 = vadd.f32 %v68_v50, %v28_v49  ;;  %v25_v58 = vld [vmem:[%s3865_s1 + $0x58] sm:$0xff] }
   0xe   :  { %744 = vmatpush1.msra.mxu0 %v116_v33  ;;  %1909 = vmatpush1.msra.mxu1 %v116_v33  ;;  %v67_v53 = vld [vmem:[%s3866_s2 + $0x68] sm:$0xff]  ;;  %v66_v56 = vld [vmem:[%s3866_s2 + $0x60] sm:$0xff]  ;;  %v65_v59 = vld [vmem:[%s3866_s2 + $0x58] sm:$0xff] }
   0xf   :  { %745 = vmatprep.subr.mxu0 %v115_v36  ;;  %1890 = vmatprep.subr.mxu1 %v115_v36  ;;  %v107_v60 = vadd.f32 %v67_v53, %v27_v52  ;;  %v24_v61 = vld [vmem:[%s3865_s1 + $0x50] sm:$0xff]  ;;  %v106_v63 = vadd.f32 %v66_v56, %v26_v55  ;;  %v23_v0 = vld [vmem:[%s3865_s1 + $0x48] sm:$0xff]  ;;  %v105_v2 = vadd.f32 %v65_v59, %v25_v58  ;;  %v22_v3 = vld [vmem:[%s3865_s1 + $0x40] sm:$0xff] }
  0x10   :  { %746 = vmatpush1.msra.mxu0 %v114_v39  ;;  %1910 = vmatpush1.msra.mxu1 %v114_v39  ;;  %v64_v62 = vld [vmem:[%s3866_s2 + $0x50] sm:$0xff]  ;;  %v63_v1 = vld [vmem:[%s3866_s2 + $0x48] sm:$0xff]  ;;  %v62_v4 = vld [vmem:[%s3866_s2 + $0x40] sm:$0xff] }
  0x11   :  { %747 = vmatprep.subr.mxu0 %v113_v42  ;;  %1891 = vmatprep.subr.mxu1 %v113_v42  ;;  %v104_v5 = vadd.f32 %v64_v62, %v24_v61  ;;  %v21_v6 = vld [vmem:[%s3865_s1 + $0x38] sm:$0xff]  ;;  %v103_v8 = vadd.f32 %v63_v1, %v23_v0  ;;  %v20_v9 = vld [vmem:[%s3865_s1 + $0x30] sm:$0xff]  ;;  %v102_v11 = vadd.f32 %v62_v4, %v22_v3  ;;  %v19_v12 = vld [vmem:[%s3865_s1 + $0x28] sm:$0xff] }
  0x12   :  { %748 = vmatpush1.msra.mxu0 %v112_v45  ;;  %1911 = vmatpush1.msra.mxu1 %v112_v45  ;;  %v61_v7 = vld [vmem:[%s3866_s2 + $0x38] sm:$0xff]  ;;  %v60_v10 = vld [vmem:[%s3866_s2 + $0x30] sm:$0xff]  ;;  %v59_v13 = vld [vmem:[%s3866_s2 + $0x28] sm:$0xff] }
  0x13   :  { %749 = vmatprep.subr.mxu0 %v111_v48  ;;  %1892 = vmatprep.subr.mxu1 %v111_v48  ;;  %v101_v14 = vadd.f32 %v61_v7, %v21_v6  ;;  %v18_v15 = vld [vmem:[%s3865_s1 + $0x20] sm:$0xff]  ;;  %v100_v17 = vadd.f32 %v60_v10, %v20_v9  ;;  %v17_v18 = vld [vmem:[%s3865_s1 + $0x18] sm:$0xff]  ;;  %v99_v20 = vadd.f32 %v59_v13, %v19_v12  ;;  %v16_v21 = vld [vmem:[%s3865_s1 + $0x10] sm:$0xff] }
  0x14   :  { %750 = vmatpush1.msra.mxu0 %v110_v51  ;;  %1912 = vmatpush1.msra.mxu1 %v110_v51  ;;  %v58_v16 = vld [vmem:[%s3866_s2 + $0x20] sm:$0xff]  ;;  %v57_v19 = vld [vmem:[%s3866_s2 + $0x18] sm:$0xff]  ;;  %v56_v22 = vld [vmem:[%s3866_s2 + $0x10] sm:$0xff] }
  0x15   :  { %751 = vmatprep.subr.mxu0 %v109_v54  ;;  %1893 = vmatprep.subr.mxu1 %v109_v54  ;;  %v98_v23 = vadd.f32 %v58_v16, %v18_v15  ;;  %v15_v24 = vld [vmem:[%s3865_s1 + $0x8] sm:$0xff]  ;;  %v97_v26 = vadd.f32 %v57_v19, %v17_v18  ;;  %v14_v27 = vld [vmem:[%s3865_s1] sm:$0xff]  ;;  %v96_v29 = vadd.f32 %v56_v22, %v16_v21  ;;  %v53_v30 = vld [vmem:[%s3865_s1 + $0x138] sm:$0xff] }
  0x16   :  { %752 = vmatpush1.msra.mxu0 %v108_v57  ;;  %1913 = vmatpush1.msra.mxu1 %v108_v57  ;;  %v55_v25 = vld [vmem:[%s3866_s2 + $0x8] sm:$0xff]  ;;  %v54_v28 = vld [vmem:[%s3866_s2] sm:$0xff]  ;;  %v93_v31 = vld [vmem:[%s3866_s2 + $0x138] sm:$0xff] }
  0x17   :  { %753 = vmatprep.subr.mxu0 %v107_v60  ;;  %1894 = vmatprep.subr.mxu1 %v107_v60  ;;  %v95_v32 = vadd.f32 %v55_v25, %v15_v24  ;;  %v52_v33 = vld [vmem:[%s3865_s1 + $0x130] sm:$0xff]  ;;  %v94_v35 = vadd.f32 %v54_v28, %v14_v27  ;;  %v51_v36 = vld [vmem:[%s3865_s1 + $0x128] sm:$0xff]  ;;  %v133_v38 = vadd.f32 %v93_v31, %v53_v30  ;;  %v50_v39 = vld [vmem:[%s3865_s1 + $0x120] sm:$0xff] }
  0x18   :  { %754 = vmatpush1.msra.mxu0 %v106_v63  ;;  %1914 = vmatpush1.msra.mxu1 %v106_v63  ;;  %v92_v34 = vld [vmem:[%s3866_s2 + $0x130] sm:$0xff]  ;;  %v91_v37 = vld [vmem:[%s3866_s2 + $0x128] sm:$0xff]  ;;  %v90_v40 = vld [vmem:[%s3866_s2 + $0x120] sm:$0xff] }
  0x19   :  { %755 = vmatprep.subr.mxu0 %v105_v2  ;;  %1895 = vmatprep.subr.mxu1 %v105_v2  ;;  %v132_v41 = vadd.f32 %v92_v34, %v52_v33  ;;  %v49_v42 = vld [vmem:[%s3865_s1 + $0x118] sm:$0xff]  ;;  %v131_v44 = vadd.f32 %v91_v37, %v51_v36  ;;  %v48_v45 = vld [vmem:[%s3865_s1 + $0x110] sm:$0xff]  ;;  %v130_v47 = vadd.f32 %v90_v40, %v50_v39  ;;  %v47_v48 = vld [vmem:[%s3865_s1 + $0x108] sm:$0xff] }
  0x1a   :  { %756 = vmatpush1.msra.mxu0 %v104_v5  ;;  %1915 = vmatpush1.msra.mxu1 %v104_v5  ;;  %v89_v43 = vld [vmem:[%s3866_s2 + $0x118] sm:$0xff]  ;;  %v88_v46 = vld [vmem:[%s3866_s2 + $0x110] sm:$0xff]  ;;  %v87_v49 = vld [vmem:[%s3866_s2 + $0x108] sm:$0xff] }
  0x1b   :  { %757 = vmatprep.subr.mxu0 %v103_v8  ;;  %1896 = vmatprep.subr.mxu1 %v103_v8  ;;  %v129_v50 = vadd.f32 %v89_v43, %v49_v42  ;;  %v46_v51 = vld [vmem:[%s3865_s1 + $0x100] sm:$0xff]  ;;  %v128_v53 = vadd.f32 %v88_v46, %v48_v45  ;;  %v127_v54 = vadd.f32 %v87_v49, %v47_v48  ;;  %v135_v56 = vld [vmem:[%s3867_s0 + $0x8] sm:$0xff]  ;;  %v137_v60 = vld [vmem:[%s3867_s0 + $0x18] sm:$0xff] }
  0x1c   :  { %758 = vmatpush1.msra.mxu0 %v102_v11  ;;  %1916 = vmatpush1.msra.mxu1 %v102_v11  ;;  %v86_v52 = vld [vmem:[%s3866_s2 + $0x100] sm:$0xff]  ;;  %v255_v57 = vld [vmem:[%s3867_s0 + $0x3c8] sm:$0xff]  ;;  %v257_v61 = vld [vmem:[%s3867_s0 + $0x3d8] sm:$0xff] }
  0x1d   :  { %759 = vmatprep.subr.mxu0 %v101_v14  ;;  %1897 = vmatprep.subr.mxu1 %v101_v14  ;;  %v126_v55 = vadd.f32 %v86_v52, %v46_v51  ;;  %v134_v58 = vld [vmem:[%s3867_s0] sm:$0xff]  ;;  %v136_v62 = vld [vmem:[%s3867_s0 + $0x10] sm:$0xff]  ;;  %v139_v0 = vld [vmem:[%s3867_s0 + $0x28] sm:$0xff] }
  0x1e   :  { %760 = vmatpush1.msra.mxu0 %v100_v17  ;;  %1917 = vmatpush1.msra.mxu1 %v100_v17  ;;  %v254_v59 = vld [vmem:[%s3867_s0 + $0x3c0] sm:$0xff]  ;;  %v256_v63 = vld [vmem:[%s3867_s0 + $0x3d0] sm:$0xff]  ;;  %v259_v1 = vld [vmem:[%s3867_s0 + $0x3e8] sm:$0xff] }
  0x1f   :  { %761 = vmatprep.subr.mxu0 %v99_v20  ;;  %1898 = vmatprep.subr.mxu1 %v99_v20  ;;  %v138_v2 = vld [vmem:[%s3867_s0 + $0x20] sm:$0xff]  ;;  %v141_v4 = vld [vmem:[%s3867_s0 + $0x38] sm:$0xff]  ;;  %v140_v6 = vld [vmem:[%s3867_s0 + $0x30] sm:$0xff] }
  0x20   :  { %762 = vmatpush1.msra.mxu0 %v98_v23  ;;  %1918 = vmatpush1.msra.mxu1 %v98_v23  ;;  %v258_v3 = vld [vmem:[%s3867_s0 + $0x3e0] sm:$0xff]  ;;  %v261_v5 = vld [vmem:[%s3867_s0 + $0x3f8] sm:$0xff]  ;;  %v260_v7 = vld [vmem:[%s3867_s0 + $0x3f0] sm:$0xff] }
  0x21   :  { %763 = vmatprep.subr.mxu0 %v97_v26  ;;  %1899 = vmatprep.subr.mxu1 %v97_v26  ;;  %v143_v8 = vld [vmem:[%s3867_s0 + $0x48] sm:$0xff]  ;;  %v142_v10 = vld [vmem:[%s3867_s0 + $0x40] sm:$0xff]  ;;  %v145_v12 = vld [vmem:[%s3867_s0 + $0x58] sm:$0xff] }
  0x22   :  { %764 = vmatpush1.msra.mxu0 %v96_v29  ;;  %1919 = vmatpush1.msra.mxu1 %v96_v29  ;;  %v263_v9 = vld [vmem:[%s3867_s0 + $0x408] sm:$0xff]  ;;  %v262_v11 = vld [vmem:[%s3867_s0 + $0x400] sm:$0xff]  ;;  %v265_v13 = vld [vmem:[%s3867_s0 + $0x418] sm:$0xff] }
  0x23   :  { %765 = vmatprep.subr.mxu0 %v95_v32  ;;  %1900 = vmatprep.subr.mxu1 %v95_v32  ;;  %v144_v14 = vld [vmem:[%s3867_s0 + $0x50] sm:$0xff]  ;;  %v147_v16 = vld [vmem:[%s3867_s0 + $0x68] sm:$0xff]  ;;  %v146_v18 = vld [vmem:[%s3867_s0 + $0x60] sm:$0xff] }
  0x24   :  { %766 = vmatpush1.msra.mxu0 %v94_v35  ;;  %1920 = vmatpush1.msra.mxu1 %v94_v35  ;;  %v264_v15 = vld [vmem:[%s3867_s0 + $0x410] sm:$0xff]  ;;  %v267_v17 = vld [vmem:[%s3867_s0 + $0x428] sm:$0xff]  ;;  %v266_v19 = vld [vmem:[%s3867_s0 + $0x420] sm:$0xff] }
  0x25   :  { %791 = vmatprep.subr.mxu0 %v133_v38  ;;  %1901 = vmatprep.subr.mxu1 %v133_v38  ;;  %v149_v20 = vld [vmem:[%s3867_s0 + $0x78] sm:$0xff]  ;;  %v148_v22 = vld [vmem:[%s3867_s0 + $0x70] sm:$0xff]  ;;  %v151_v24 = vld [vmem:[%s3867_s0 + $0x88] sm:$0xff] }
  0x26   :  { %792 = vmatpush2.msra.mxu0 %v132_v41  ;;  %1921 = vmatpush2.msra.mxu1 %v132_v41  ;;  %v269_v21 = vld [vmem:[%s3867_s0 + $0x438] sm:$0xff]  ;;  %v268_v23 = vld [vmem:[%s3867_s0 + $0x430] sm:$0xff]  ;;  %v271_v25 = vld [vmem:[%s3867_s0 + $0x448] sm:$0xff] }
  0x27   :  { %793 = vmatprep.subr.mxu0 %v131_v44  ;;  %1902 = vmatprep.subr.mxu1 %v131_v44  ;;  %v150_v26 = vld [vmem:[%s3867_s0 + $0x80] sm:$0xff]  ;;  %v153_v28 = vld [vmem:[%s3867_s0 + $0x98] sm:$0xff]  ;;  %v152_v30 = vld [vmem:[%s3867_s0 + $0x90] sm:$0xff] }
  0x28   :  { %794 = vmatpush2.msra.mxu0 %v130_v47  ;;  %1922 = vmatpush2.msra.mxu1 %v130_v47  ;;  %v270_v27 = vld [vmem:[%s3867_s0 + $0x440] sm:$0xff]  ;;  %v273_v29 = vld [vmem:[%s3867_s0 + $0x458] sm:$0xff]  ;;  %v272_v31 = vld [vmem:[%s3867_s0 + $0x450] sm:$0xff] }
  0x29   :  { %795 = vmatprep.subr.mxu0 %v129_v50  ;;  %1903 = vmatprep.subr.mxu1 %v129_v50  ;;  %v155_v32 = vld [vmem:[%s3867_s0 + $0xa8] sm:$0xff]  ;;  %v154_v34 = vld [vmem:[%s3867_s0 + $0xa0] sm:$0xff]  ;;  %v157_v36 = vld [vmem:[%s3867_s0 + $0xb8] sm:$0xff] }
  0x2a   :  { %796 = vmatpush2.msra.mxu0 %v128_v53  ;;  %1923 = vmatpush2.msra.mxu1 %v128_v53  ;;  %v275_v33 = vld [vmem:[%s3867_s0 + $0x468] sm:$0xff]  ;;  %v274_v35 = vld [vmem:[%s3867_s0 + $0x460] sm:$0xff]  ;;  %v277_v37 = vld [vmem:[%s3867_s0 + $0x478] sm:$0xff] }
  0x2b   :  { %797 = vmatprep.subr.mxu0 %v127_v54  ;;  %1904 = vmatprep.subr.mxu1 %v127_v54  ;;  %v156_v38 = vld [vmem:[%s3867_s0 + $0xb0] sm:$0xff]  ;;  %v159_v40 = vld [vmem:[%s3867_s0 + $0xc8] sm:$0xff]  ;;  %v158_v42 = vld [vmem:[%s3867_s0 + $0xc0] sm:$0xff] }
  0x2c   :  { %798 = vmatpush2.msra.mxu0 %v126_v55  ;;  %1924 = vmatpush2.msra.mxu1 %v126_v55  ;;  %v276_v39 = vld [vmem:[%s3867_s0 + $0x470] sm:$0xff]  ;;  %v279_v41 = vld [vmem:[%s3867_s0 + $0x488] sm:$0xff]  ;;  %v278_v43 = vld [vmem:[%s3867_s0 + $0x480] sm:$0xff] }
  0x2d   :  { %1765 = vmatprep.mubr.msk.f32.mxu0 %vm374_vm0, %v135_v56  ;;  %1825 = vmatprep.mubr.msk.f32.mxu1 %vm374_vm0, %v255_v57  ;;  %v161_v44 = vld [vmem:[%s3867_s0 + $0xd8] sm:$0xff]  ;;  %v160_v46 = vld [vmem:[%s3867_s0 + $0xd0] sm:$0xff]  ;;  %v163_v48 = vld [vmem:[%s3867_s0 + $0xe8] sm:$0xff] }
  0x2e   :  { %800 = vmatmul.mubr.f32.vlgmr.msra.gmra.mxu0 %v134_v58  ;;  %1160 = vmatmul.mubr.f32.vlgmr.msra.gmra.mxu1 %v254_v59  ;;  %v281_v45 = vld [vmem:[%s3867_s0 + $0x498] sm:$0xff]  ;;  %v280_v47 = vld [vmem:[%s3867_s0 + $0x490] sm:$0xff]  ;;  %v283_v49 = vld [vmem:[%s3867_s0 + $0x4a8] sm:$0xff] }
  0x2f   :  { %1766 = vmatprep.mubr.msk.f32.mxu0 %vm374_vm0, %v137_v60  ;;  %1826 = vmatprep.mubr.msk.f32.mxu1 %vm374_vm0, %v257_v61  ;;  %v162_v50 = vld [vmem:[%s3867_s0 + $0xe0] sm:$0xff]  ;;  %v165_v52 = vld [vmem:[%s3867_s0 + $0xf8] sm:$0xff]  ;;  %v164_v54 = vld [vmem:[%s3867_s0 + $0xf0] sm:$0xff] }
  0x30   :  { %v282_v51 = vld [vmem:[%s3867_s0 + $0x4a0] sm:$0xff]  ;;  %v285_v53 = vld [vmem:[%s3867_s0 + $0x4b8] sm:$0xff]  ;;  %v284_v55 = vld [vmem:[%s3867_s0 + $0x4b0] sm:$0xff] }
  0x31   :  { %v167_v56 = vld [vmem:[%s3867_s0 + $0x108] sm:$0xff]  ;;  %v166_v58 = vld [vmem:[%s3867_s0 + $0x100] sm:$0xff]  ;;  %v169_v60 = vld [vmem:[%s3867_s0 + $0x118] sm:$0xff] }
  0x32   :  { %806 = vmatmul.mubr.f32.gmra.mxu0 %v136_v62  ;;  %1166 = vmatmul.mubr.f32.gmra.mxu1 %v256_v63  ;;  %v287_v57 = vld [vmem:[%s3867_s0 + $0x4c8] sm:$0xff]  ;;  %v286_v59 = vld [vmem:[%s3867_s0 + $0x4c0] sm:$0xff]  ;;  %v289_v61 = vld [vmem:[%s3867_s0 + $0x4d8] sm:$0xff] }
  0x33   :  { %1767 = vmatprep.mubr.msk.f32.mxu0 %vm374_vm0, %v139_v0  ;;  %1827 = vmatprep.mubr.msk.f32.mxu1 %vm374_vm0, %v259_v1  ;;  %v168_v62 = vld [vmem:[%s3867_s0 + $0x110] sm:$0xff]  ;;  %v171_v0 = vld [vmem:[%s3867_s0 + $0x128] sm:$0xff] }
  0x34   :  { %v288_v63 = vld [vmem:[%s3867_s0 + $0x4d0] sm:$0xff]  ;;  %v291_v1 = vld [vmem:[%s3867_s0 + $0x4e8] sm:$0xff] }
  0x36   :  { %812 = vmatmul.mubr.f32.gmra.mxu0 %v138_v2  ;;  %1172 = vmatmul.mubr.f32.gmra.mxu1 %v258_v3  ;;  %v170_v2 = vld [vmem:[%s3867_s0 + $0x120] sm:$0xff] }
  0x37   :  { %1768 = vmatprep.mubr.msk.f32.mxu0 %vm374_vm0, %v141_v4  ;;  %1828 = vmatprep.mubr.msk.f32.mxu1 %vm374_vm0, %v261_v5  ;;  %v290_v3 = vld [vmem:[%s3867_s0 + $0x4e0] sm:$0xff]  ;;  %v173_v4 = vld [vmem:[%s3867_s0 + $0x138] sm:$0xff] }
  0x38   :  { %v293_v5 = vld [vmem:[%s3867_s0 + $0x4f8] sm:$0xff] }
  0x3a   :  { %818 = vmatmul.mubr.f32.gmra.mxu0 %v140_v6  ;;  %1178 = vmatmul.mubr.f32.gmra.mxu1 %v260_v7  ;;  %v172_v6 = vld [vmem:[%s3867_s0 + $0x130] sm:$0xff] }
  0x3b   :  { %1769 = vmatprep.mubr.msk.f32.mxu0 %vm374_vm0, %v143_v8  ;;  %1829 = vmatprep.mubr.msk.f32.mxu1 %vm374_vm0, %v263_v9  ;;  %v292_v7 = vld [vmem:[%s3867_s0 + $0x4f0] sm:$0xff]  ;;  %v175_v8 = vld [vmem:[%s3867_s0 + $0x148] sm:$0xff] }
  0x3c   :  { %v295_v9 = vld [vmem:[%s3867_s0 + $0x508] sm:$0xff] }
  0x3e   :  { %824 = vmatmul.mubr.f32.gmra.mxu0 %v142_v10  ;;  %1184 = vmatmul.mubr.f32.gmra.mxu1 %v262_v11  ;;  %v174_v10 = vld [vmem:[%s3867_s0 + $0x140] sm:$0xff] }
  0x3f   :  { %1770 = vmatprep.mubr.msk.f32.mxu0 %vm374_vm0, %v145_v12  ;;  %1830 = vmatprep.mubr.msk.f32.mxu1 %vm374_vm0, %v265_v13  ;;  %v294_v11 = vld [vmem:[%s3867_s0 + $0x500] sm:$0xff]  ;;  %v177_v12 = vld [vmem:[%s3867_s0 + $0x158] sm:$0xff] }
  0x40   :  { %v297_v13 = vld [vmem:[%s3867_s0 + $0x518] sm:$0xff] }
  0x42   :  { %830 = vmatmul.mubr.f32.gmra.mxu0 %v144_v14  ;;  %1190 = vmatmul.mubr.f32.gmra.mxu1 %v264_v15  ;;  %v176_v14 = vld [vmem:[%s3867_s0 + $0x150] sm:$0xff] }
  0x43   :  { %1771 = vmatprep.mubr.msk.f32.mxu0 %vm374_vm0, %v147_v16  ;;  %1831 = vmatprep.mubr.msk.f32.mxu1 %vm374_vm0, %v267_v17  ;;  %v296_v15 = vld [vmem:[%s3867_s0 + $0x510] sm:$0xff]  ;;  %v179_v16 = vld [vmem:[%s3867_s0 + $0x168] sm:$0xff] }
  0x44   :  { %v299_v17 = vld [vmem:[%s3867_s0 + $0x528] sm:$0xff] }
  0x46   :  { %836 = vmatmul.mubr.f32.gmra.mxu0 %v146_v18  ;;  %1196 = vmatmul.mubr.f32.gmra.mxu1 %v266_v19  ;;  %v178_v18 = vld [vmem:[%s3867_s0 + $0x160] sm:$0xff] }
  0x47   :  { %1772 = vmatprep.mubr.msk.f32.mxu0 %vm374_vm0, %v149_v20  ;;  %1832 = vmatprep.mubr.msk.f32.mxu1 %vm374_vm0, %v269_v21  ;;  %v298_v19 = vld [vmem:[%s3867_s0 + $0x520] sm:$0xff]  ;;  %v181_v20 = vld [vmem:[%s3867_s0 + $0x178] sm:$0xff] }
  0x48   :  { %v301_v21 = vld [vmem:[%s3867_s0 + $0x538] sm:$0xff] }
  0x4a   :  { %842 = vmatmul.mubr.f32.gmra.mxu0 %v148_v22  ;;  %1202 = vmatmul.mubr.f32.gmra.mxu1 %v268_v23  ;;  %v180_v22 = vld [vmem:[%s3867_s0 + $0x170] sm:$0xff] }
  0x4b   :  { %1773 = vmatprep.mubr.msk.f32.mxu0 %vm374_vm0, %v151_v24  ;;  %1833 = vmatprep.mubr.msk.f32.mxu1 %vm374_vm0, %v271_v25  ;;  %v300_v23 = vld [vmem:[%s3867_s0 + $0x530] sm:$0xff]  ;;  %v183_v24 = vld [vmem:[%s3867_s0 + $0x188] sm:$0xff] }
  0x4c   :  { %v303_v25 = vld [vmem:[%s3867_s0 + $0x548] sm:$0xff] }
  0x4e   :  { %848 = vmatmul.mubr.f32.gmra.mxu0 %v150_v26  ;;  %1208 = vmatmul.mubr.f32.gmra.mxu1 %v270_v27  ;;  %v182_v26 = vld [vmem:[%s3867_s0 + $0x180] sm:$0xff] }
  0x4f   :  { %1774 = vmatprep.mubr.msk.f32.mxu0 %vm374_vm0, %v153_v28  ;;  %1834 = vmatprep.mubr.msk.f32.mxu1 %vm374_vm0, %v273_v29  ;;  %v302_v27 = vld [vmem:[%s3867_s0 + $0x540] sm:$0xff]  ;;  %v185_v28 = vld [vmem:[%s3867_s0 + $0x198] sm:$0xff] }
  0x50   :  { %v305_v29 = vld [vmem:[%s3867_s0 + $0x558] sm:$0xff] }
  0x52   :  { %854 = vmatmul.mubr.f32.gmra.mxu0 %v152_v30  ;;  %1214 = vmatmul.mubr.f32.gmra.mxu1 %v272_v31  ;;  %v184_v30 = vld [vmem:[%s3867_s0 + $0x190] sm:$0xff] }
  0x53   :  { %1775 = vmatprep.mubr.msk.f32.mxu0 %vm374_vm0, %v155_v32  ;;  %1835 = vmatprep.mubr.msk.f32.mxu1 %vm374_vm0, %v275_v33  ;;  %v304_v31 = vld [vmem:[%s3867_s0 + $0x550] sm:$0xff]  ;;  %v187_v32 = vld [vmem:[%s3867_s0 + $0x1a8] sm:$0xff] }
  0x54   :  { %v307_v33 = vld [vmem:[%s3867_s0 + $0x568] sm:$0xff] }
  0x56   :  { %860 = vmatmul.mubr.f32.gmra.mxu0 %v154_v34  ;;  %1220 = vmatmul.mubr.f32.gmra.mxu1 %v274_v35  ;;  %v186_v34 = vld [vmem:[%s3867_s0 + $0x1a0] sm:$0xff] }
  0x57   :  { %1776 = vmatprep.mubr.msk.f32.mxu0 %vm374_vm0, %v157_v36  ;;  %1836 = vmatprep.mubr.msk.f32.mxu1 %vm374_vm0, %v277_v37  ;;  %v306_v35 = vld [vmem:[%s3867_s0 + $0x560] sm:$0xff]  ;;  %v189_v36 = vld [vmem:[%s3867_s0 + $0x1b8] sm:$0xff] }
  0x58   :  { %v309_v37 = vld [vmem:[%s3867_s0 + $0x578] sm:$0xff] }
  0x5a   :  { %866 = vmatmul.mubr.f32.gmra.mxu0 %v156_v38  ;;  %1226 = vmatmul.mubr.f32.gmra.mxu1 %v276_v39  ;;  %v188_v38 = vld [vmem:[%s3867_s0 + $0x1b0] sm:$0xff] }
  0x5b   :  { %1777 = vmatprep.mubr.msk.f32.mxu0 %vm374_vm0, %v159_v40  ;;  %1837 = vmatprep.mubr.msk.f32.mxu1 %vm374_vm0, %v279_v41  ;;  %v308_v39 = vld [vmem:[%s3867_s0 + $0x570] sm:$0xff]  ;;  %v191_v40 = vld [vmem:[%s3867_s0 + $0x1c8] sm:$0xff] }
  0x5c   :  { %v311_v41 = vld [vmem:[%s3867_s0 + $0x588] sm:$0xff] }
  0x5e   :  { %872 = vmatmul.mubr.f32.gmra.mxu0 %v158_v42  ;;  %1232 = vmatmul.mubr.f32.gmra.mxu1 %v278_v43  ;;  %v190_v42 = vld [vmem:[%s3867_s0 + $0x1c0] sm:$0xff] }
  0x5f   :  { %1778 = vmatprep.mubr.msk.f32.mxu0 %vm374_vm0, %v161_v44  ;;  %1838 = vmatprep.mubr.msk.f32.mxu1 %vm374_vm0, %v281_v45  ;;  %v310_v43 = vld [vmem:[%s3867_s0 + $0x580] sm:$0xff]  ;;  %v193_v44 = vld [vmem:[%s3867_s0 + $0x1d8] sm:$0xff] }
  0x60   :  { %v313_v45 = vld [vmem:[%s3867_s0 + $0x598] sm:$0xff] }
  0x62   :  { %878 = vmatmul.mubr.f32.gmra.mxu0 %v160_v46  ;;  %1238 = vmatmul.mubr.f32.gmra.mxu1 %v280_v47  ;;  %v192_v46 = vld [vmem:[%s3867_s0 + $0x1d0] sm:$0xff] }
  0x63   :  { %1779 = vmatprep.mubr.msk.f32.mxu0 %vm374_vm0, %v163_v48  ;;  %1839 = vmatprep.mubr.msk.f32.mxu1 %vm374_vm0, %v283_v49  ;;  %v312_v47 = vld [vmem:[%s3867_s0 + $0x590] sm:$0xff]  ;;  %v195_v48 = vld [vmem:[%s3867_s0 + $0x1e8] sm:$0xff] }
  0x64   :  { %v315_v49 = vld [vmem:[%s3867_s0 + $0x5a8] sm:$0xff] }
  0x66   :  { %884 = vmatmul.mubr.f32.gmra.mxu0 %v162_v50  ;;  %1244 = vmatmul.mubr.f32.gmra.mxu1 %v282_v51  ;;  %v194_v50 = vld [vmem:[%s3867_s0 + $0x1e0] sm:$0xff] }
  0x67   :  { %1780 = vmatprep.mubr.msk.f32.mxu0 %vm374_vm0, %v165_v52  ;;  %1840 = vmatprep.mubr.msk.f32.mxu1 %vm374_vm0, %v285_v53  ;;  %v314_v51 = vld [vmem:[%s3867_s0 + $0x5a0] sm:$0xff]  ;;  %v197_v52 = vld [vmem:[%s3867_s0 + $0x1f8] sm:$0xff] }
  0x68   :  { %v317_v53 = vld [vmem:[%s3867_s0 + $0x5b8] sm:$0xff] }
  0x6a   :  { %890 = vmatmul.mubr.f32.gmra.mxu0 %v164_v54  ;;  %1250 = vmatmul.mubr.f32.gmra.mxu1 %v284_v55  ;;  %v196_v54 = vld [vmem:[%s3867_s0 + $0x1f0] sm:$0xff] }
  0x6b   :  { %1781 = vmatprep.mubr.msk.f32.mxu0 %vm374_vm0, %v167_v56  ;;  %1841 = vmatprep.mubr.msk.f32.mxu1 %vm374_vm0, %v287_v57  ;;  %v316_v55 = vld [vmem:[%s3867_s0 + $0x5b0] sm:$0xff]  ;;  %v199_v56 = vld [vmem:[%s3867_s0 + $0x208] sm:$0xff] }
  0x6c   :  { %v319_v57 = vld [vmem:[%s3867_s0 + $0x5c8] sm:$0xff] }
  0x6e   :  { %896 = vmatmul.mubr.f32.gmra.mxu0 %v166_v58  ;;  %1256 = vmatmul.mubr.f32.gmra.mxu1 %v286_v59  ;;  %v198_v58 = vld [vmem:[%s3867_s0 + $0x200] sm:$0xff] }
  0x6f   :  { %1782 = vmatprep.mubr.msk.f32.mxu0 %vm374_vm0, %v169_v60  ;;  %1842 = vmatprep.mubr.msk.f32.mxu1 %vm374_vm0, %v289_v61  ;;  %v318_v59 = vld [vmem:[%s3867_s0 + $0x5c0] sm:$0xff]  ;;  %v201_v60 = vld [vmem:[%s3867_s0 + $0x218] sm:$0xff] }
  0x70   :  { %v321_v61 = vld [vmem:[%s3867_s0 + $0x5d8] sm:$0xff] }
  0x72   :  { %902 = vmatmul.mubr.f32.gmra.mxu0 %v168_v62  ;;  %1262 = vmatmul.mubr.f32.gmra.mxu1 %v288_v63  ;;  %v200_v62 = vld [vmem:[%s3867_s0 + $0x210] sm:$0xff] }
  0x73   :  { %1783 = vmatprep.mubr.msk.f32.mxu0 %vm374_vm0, %v171_v0  ;;  %1843 = vmatprep.mubr.msk.f32.mxu1 %vm374_vm0, %v291_v1  ;;  %v320_v63 = vld [vmem:[%s3867_s0 + $0x5d0] sm:$0xff]  ;;  %v203_v0 = vld [vmem:[%s3867_s0 + $0x228] sm:$0xff] }
  0x74   :  { %v323_v1 = vld [vmem:[%s3867_s0 + $0x5e8] sm:$0xff] }
  0x76   :  { %908 = vmatmul.mubr.f32.gmra.mxu0 %v170_v2  ;;  %1268 = vmatmul.mubr.f32.gmra.mxu1 %v290_v3  ;;  %v202_v2 = vld [vmem:[%s3867_s0 + $0x220] sm:$0xff] }
  0x77   :  { %1784 = vmatprep.mubr.msk.f32.mxu0 %vm374_vm0, %v173_v4  ;;  %1844 = vmatprep.mubr.msk.f32.mxu1 %vm374_vm0, %v293_v5  ;;  %v322_v3 = vld [vmem:[%s3867_s0 + $0x5e0] sm:$0xff]  ;;  %v205_v4 = vld [vmem:[%s3867_s0 + $0x238] sm:$0xff] }
  0x78   :  { %v325_v5 = vld [vmem:[%s3867_s0 + $0x5f8] sm:$0xff] }
  0x7a   :  { %914 = vmatmul.mubr.f32.gmra.mxu0 %v172_v6  ;;  %1274 = vmatmul.mubr.f32.gmra.mxu1 %v292_v7  ;;  %v204_v6 = vld [vmem:[%s3867_s0 + $0x230] sm:$0xff] }
  0x7b   :  { %1785 = vmatprep.mubr.msk.f32.mxu0 %vm374_vm0, %v175_v8  ;;  %1845 = vmatprep.mubr.msk.f32.mxu1 %vm374_vm0, %v295_v9  ;;  %v324_v7 = vld [vmem:[%s3867_s0 + $0x5f0] sm:$0xff]  ;;  %v207_v8 = vld [vmem:[%s3867_s0 + $0x248] sm:$0xff] }
  0x7c   :  { %v327_v9 = vld [vmem:[%s3867_s0 + $0x608] sm:$0xff] }
  0x7e   :  { %920 = vmatmul.mubr.f32.gmra.mxu0 %v174_v10  ;;  %1280 = vmatmul.mubr.f32.gmra.mxu1 %v294_v11  ;;  %v206_v10 = vld [vmem:[%s3867_s0 + $0x240] sm:$0xff] }
  0x7f   :  { %1786 = vmatprep.mubr.msk.f32.mxu0 %vm374_vm0, %v177_v12  ;;  %1846 = vmatprep.mubr.msk.f32.mxu1 %vm374_vm0, %v297_v13  ;;  %v326_v11 = vld [vmem:[%s3867_s0 + $0x600] sm:$0xff]  ;;  %v209_v12 = vld [vmem:[%s3867_s0 + $0x258] sm:$0xff] }
  0x80   :  { %v329_v13 = vld [vmem:[%s3867_s0 + $0x618] sm:$0xff] }
  0x82   :  { %926 = vmatmul.mubr.f32.gmra.mxu0 %v176_v14  ;;  %1286 = vmatmul.mubr.f32.gmra.mxu1 %v296_v15  ;;  %v208_v14 = vld [vmem:[%s3867_s0 + $0x250] sm:$0xff] }
  0x83   :  { %1787 = vmatprep.mubr.msk.f32.mxu0 %vm374_vm0, %v179_v16  ;;  %1847 = vmatprep.mubr.msk.f32.mxu1 %vm374_vm0, %v299_v17  ;;  %v328_v15 = vld [vmem:[%s3867_s0 + $0x610] sm:$0xff]  ;;  %v211_v16 = vld [vmem:[%s3867_s0 + $0x268] sm:$0xff] }
  0x84   :  { %v331_v17 = vld [vmem:[%s3867_s0 + $0x628] sm:$0xff] }
  0x86   :  { %932 = vmatmul.mubr.f32.gmra.mxu0 %v178_v18  ;;  %1292 = vmatmul.mubr.f32.gmra.mxu1 %v298_v19  ;;  %v210_v18 = vld [vmem:[%s3867_s0 + $0x260] sm:$0xff] }
  0x87   :  { %1788 = vmatprep.mubr.msk.f32.mxu0 %vm374_vm0, %v181_v20  ;;  %1848 = vmatprep.mubr.msk.f32.mxu1 %vm374_vm0, %v301_v21  ;;  %v330_v19 = vld [vmem:[%s3867_s0 + $0x620] sm:$0xff]  ;;  %v213_v20 = vld [vmem:[%s3867_s0 + $0x278] sm:$0xff] }
  0x88   :  { %v333_v21 = vld [vmem:[%s3867_s0 + $0x638] sm:$0xff] }
  0x8a   :  { %938 = vmatmul.mubr.f32.gmra.mxu0 %v180_v22  ;;  %1298 = vmatmul.mubr.f32.gmra.mxu1 %v300_v23  ;;  %v212_v22 = vld [vmem:[%s3867_s0 + $0x270] sm:$0xff] }
  0x8b   :  { %1789 = vmatprep.mubr.msk.f32.mxu0 %vm374_vm0, %v183_v24  ;;  %1849 = vmatprep.mubr.msk.f32.mxu1 %vm374_vm0, %v303_v25  ;;  %v332_v23 = vld [vmem:[%s3867_s0 + $0x630] sm:$0xff]  ;;  %v215_v24 = vld [vmem:[%s3867_s0 + $0x288] sm:$0xff] }
  0x8c   :  { %v335_v25 = vld [vmem:[%s3867_s0 + $0x648] sm:$0xff] }
  0x8e   :  { %944 = vmatmul.mubr.f32.gmra.mxu0 %v182_v26  ;;  %1304 = vmatmul.mubr.f32.gmra.mxu1 %v302_v27  ;;  %v214_v26 = vld [vmem:[%s3867_s0 + $0x280] sm:$0xff] }
  0x8f   :  { %1790 = vmatprep.mubr.msk.f32.mxu0 %vm374_vm0, %v185_v28  ;;  %1850 = vmatprep.mubr.msk.f32.mxu1 %vm374_vm0, %v305_v29  ;;  %v334_v27 = vld [vmem:[%s3867_s0 + $0x640] sm:$0xff]  ;;  %v217_v28 = vld [vmem:[%s3867_s0 + $0x298] sm:$0xff] }
  0x90   :  { %v337_v29 = vld [vmem:[%s3867_s0 + $0x658] sm:$0xff] }
  0x92   :  { %950 = vmatmul.mubr.f32.gmra.mxu0 %v184_v30  ;;  %1310 = vmatmul.mubr.f32.gmra.mxu1 %v304_v31  ;;  %v216_v30 = vld [vmem:[%s3867_s0 + $0x290] sm:$0xff] }
  0x93   :  { %1791 = vmatprep.mubr.msk.f32.mxu0 %vm374_vm0, %v187_v32  ;;  %1851 = vmatprep.mubr.msk.f32.mxu1 %vm374_vm0, %v307_v33  ;;  %v336_v31 = vld [vmem:[%s3867_s0 + $0x650] sm:$0xff]  ;;  %v219_v32 = vld [vmem:[%s3867_s0 + $0x2a8] sm:$0xff] }
  0x94   :  { %v339_v33 = vld [vmem:[%s3867_s0 + $0x668] sm:$0xff] }
  0x96   :  { %956 = vmatmul.mubr.f32.gmra.mxu0 %v186_v34  ;;  %1316 = vmatmul.mubr.f32.gmra.mxu1 %v306_v35  ;;  %v218_v34 = vld [vmem:[%s3867_s0 + $0x2a0] sm:$0xff] }
  0x97   :  { %1792 = vmatprep.mubr.msk.f32.mxu0 %vm374_vm0, %v189_v36  ;;  %1852 = vmatprep.mubr.msk.f32.mxu1 %vm374_vm0, %v309_v37  ;;  %v338_v35 = vld [vmem:[%s3867_s0 + $0x660] sm:$0xff]  ;;  %v221_v36 = vld [vmem:[%s3867_s0 + $0x2b8] sm:$0xff] }
  0x98   :  { %v341_v37 = vld [vmem:[%s3867_s0 + $0x678] sm:$0xff] }
  0x9a   :  { %962 = vmatmul.mubr.f32.gmra.mxu0 %v188_v38  ;;  %1322 = vmatmul.mubr.f32.gmra.mxu1 %v308_v39  ;;  %v220_v38 = vld [vmem:[%s3867_s0 + $0x2b0] sm:$0xff] }
  0x9b   :  { %1793 = vmatprep.mubr.msk.f32.mxu0 %vm374_vm0, %v191_v40  ;;  %1853 = vmatprep.mubr.msk.f32.mxu1 %vm374_vm0, %v311_v41  ;;  %v340_v39 = vld [vmem:[%s3867_s0 + $0x670] sm:$0xff]  ;;  %v223_v40 = vld [vmem:[%s3867_s0 + $0x2c8] sm:$0xff] }
  0x9c   :  { %v343_v41 = vld [vmem:[%s3867_s0 + $0x688] sm:$0xff] }
  0x9e   :  { %968 = vmatmul.mubr.f32.gmra.mxu0 %v190_v42  ;;  %1328 = vmatmul.mubr.f32.gmra.mxu1 %v310_v43  ;;  %v222_v42 = vld [vmem:[%s3867_s0 + $0x2c0] sm:$0xff] }
  0x9f   :  { %1794 = vmatprep.mubr.msk.f32.mxu0 %vm374_vm0, %v193_v44  ;;  %1854 = vmatprep.mubr.msk.f32.mxu1 %vm374_vm0, %v313_v45  ;;  %v342_v43 = vld [vmem:[%s3867_s0 + $0x680] sm:$0xff]  ;;  %v225_v44 = vld [vmem:[%s3867_s0 + $0x2d8] sm:$0xff] }
  0xa0   :  { %v345_v45 = vld [vmem:[%s3867_s0 + $0x698] sm:$0xff] }
  0xa2   :  { %974 = vmatmul.mubr.f32.gmra.mxu0 %v192_v46  ;;  %1334 = vmatmul.mubr.f32.gmra.mxu1 %v312_v47  ;;  %v224_v46 = vld [vmem:[%s3867_s0 + $0x2d0] sm:$0xff] }
  0xa3   :  { %1795 = vmatprep.mubr.msk.f32.mxu0 %vm374_vm0, %v195_v48  ;;  %1855 = vmatprep.mubr.msk.f32.mxu1 %vm374_vm0, %v315_v49  ;;  %v344_v47 = vld [vmem:[%s3867_s0 + $0x690] sm:$0xff]  ;;  %v227_v48 = vld [vmem:[%s3867_s0 + $0x2e8] sm:$0xff] }
  0xa4   :  { %v347_v49 = vld [vmem:[%s3867_s0 + $0x6a8] sm:$0xff] }
  0xa6   :  { %980 = vmatmul.mubr.f32.gmra.mxu0 %v194_v50  ;;  %1340 = vmatmul.mubr.f32.gmra.mxu1 %v314_v51  ;;  %v226_v50 = vld [vmem:[%s3867_s0 + $0x2e0] sm:$0xff] }
  0xa7   :  { %1796 = vmatprep.mubr.msk.f32.mxu0 %vm374_vm0, %v197_v52  ;;  %1856 = vmatprep.mubr.msk.f32.mxu1 %vm374_vm0, %v317_v53  ;;  %v346_v51 = vld [vmem:[%s3867_s0 + $0x6a0] sm:$0xff]  ;;  %v229_v52 = vld [vmem:[%s3867_s0 + $0x2f8] sm:$0xff] }
  0xa8   :  { %v349_v53 = vld [vmem:[%s3867_s0 + $0x6b8] sm:$0xff] }
  0xaa   :  { %986 = vmatmul.mubr.f32.gmra.mxu0 %v196_v54  ;;  %1346 = vmatmul.mubr.f32.gmra.mxu1 %v316_v55  ;;  %v228_v54 = vld [vmem:[%s3867_s0 + $0x2f0] sm:$0xff] }
  0xab   :  { %1797 = vmatprep.mubr.msk.f32.mxu0 %vm374_vm0, %v199_v56  ;;  %1857 = vmatprep.mubr.msk.f32.mxu1 %vm374_vm0, %v319_v57  ;;  %v348_v55 = vld [vmem:[%s3867_s0 + $0x6b0] sm:$0xff]  ;;  %v231_v56 = vld [vmem:[%s3867_s0 + $0x308] sm:$0xff] }
  0xac   :  { %v351_v57 = vld [vmem:[%s3867_s0 + $0x6c8] sm:$0xff] }
  0xae   :  { %992 = vmatmul.mubr.f32.gmra.mxu0 %v198_v58  ;;  %1352 = vmatmul.mubr.f32.gmra.mxu1 %v318_v59  ;;  %v230_v58 = vld [vmem:[%s3867_s0 + $0x300] sm:$0xff] }
  0xaf   :  { %1798 = vmatprep.mubr.msk.f32.mxu0 %vm374_vm0, %v201_v60  ;;  %1858 = vmatprep.mubr.msk.f32.mxu1 %vm374_vm0, %v321_v61  ;;  %v350_v59 = vld [vmem:[%s3867_s0 + $0x6c0] sm:$0xff]  ;;  %v233_v60 = vld [vmem:[%s3867_s0 + $0x318] sm:$0xff] }
  0xb0   :  { %v353_v61 = vld [vmem:[%s3867_s0 + $0x6d8] sm:$0xff] }
  0xb2   :  { %998 = vmatmul.mubr.f32.gmra.mxu0 %v200_v62  ;;  %1358 = vmatmul.mubr.f32.gmra.mxu1 %v320_v63 }
  0xb3   :  { %1799 = vmatprep.mubr.msk.f32.mxu0 %vm374_vm0, %v203_v0  ;;  %1859 = vmatprep.mubr.msk.f32.mxu1 %vm374_vm0, %v323_v1  ;;  %v232_v0 = vld [vmem:[%s3867_s0 + $0x310] sm:$0xff] }
  0xb4   :  { %v352_v1 = vld [vmem:[%s3867_s0 + $0x6d0] sm:$0xff] }
  0xb6   :  { %1004 = vmatmul.mubr.f32.gmra.mxu0 %v202_v2  ;;  %1364 = vmatmul.mubr.f32.gmra.mxu1 %v322_v3 }
  0xb7   :  { %1800 = vmatprep.mubr.msk.f32.mxu0 %vm374_vm0, %v205_v4  ;;  %1860 = vmatprep.mubr.msk.f32.mxu1 %vm374_vm0, %v325_v5  ;;  %v235_v4 = vld [vmem:[%s3867_s0 + $0x328] sm:$0xff] }
  0xb8   :  { %v355_v5 = vld [vmem:[%s3867_s0 + $0x6e8] sm:$0xff] }
  0xba   :  { %1010 = vmatmul.mubr.f32.gmra.mxu0 %v204_v6  ;;  %1370 = vmatmul.mubr.f32.gmra.mxu1 %v324_v7 }
  0xbb   :  { %1801 = vmatprep.mubr.msk.f32.mxu0 %vm374_vm0, %v207_v8  ;;  %1861 = vmatprep.mubr.msk.f32.mxu1 %vm374_vm0, %v327_v9  ;;  %v234_v8 = vld [vmem:[%s3867_s0 + $0x320] sm:$0xff] }
  0xbc   :  { %v354_v9 = vld [vmem:[%s3867_s0 + $0x6e0] sm:$0xff] }
  0xbe   :  { %1016 = vmatmul.mubr.f32.gmra.mxu0 %v206_v10  ;;  %1376 = vmatmul.mubr.f32.gmra.mxu1 %v326_v11 }
  0xbf   :  { %1802 = vmatprep.mubr.msk.f32.mxu0 %vm374_vm0, %v209_v12  ;;  %1862 = vmatprep.mubr.msk.f32.mxu1 %vm374_vm0, %v329_v13  ;;  %v237_v12 = vld [vmem:[%s3867_s0 + $0x338] sm:$0xff] }
  0xc0   :  { %v357_v13 = vld [vmem:[%s3867_s0 + $0x6f8] sm:$0xff] }
  0xc2   :  { %1022 = vmatmul.mubr.f32.gmra.mxu0 %v208_v14  ;;  %1382 = vmatmul.mubr.f32.gmra.mxu1 %v328_v15 }
  0xc3   :  { %1803 = vmatprep.mubr.msk.f32.mxu0 %vm374_vm0, %v211_v16  ;;  %1863 = vmatprep.mubr.msk.f32.mxu1 %vm374_vm0, %v331_v17  ;;  %v236_v16 = vld [vmem:[%s3867_s0 + $0x330] sm:$0xff] }
  0xc4   :  { %v356_v17 = vld [vmem:[%s3867_s0 + $0x6f0] sm:$0xff] }
  0xc6   :  { %1028 = vmatmul.mubr.f32.gmra.mxu0 %v210_v18  ;;  %1388 = vmatmul.mubr.f32.gmra.mxu1 %v330_v19 }
  0xc7   :  { %1804 = vmatprep.mubr.msk.f32.mxu0 %vm374_vm0, %v213_v20  ;;  %1864 = vmatprep.mubr.msk.f32.mxu1 %vm374_vm0, %v333_v21  ;;  %v239_v20 = vld [vmem:[%s3867_s0 + $0x348] sm:$0xff] }
  0xc8   :  { %v359_v21 = vld [vmem:[%s3867_s0 + $0x708] sm:$0xff] }
  0xca   :  { %1034 = vmatmul.mubr.f32.gmra.mxu0 %v212_v22  ;;  %1394 = vmatmul.mubr.f32.gmra.mxu1 %v332_v23 }
  0xcb   :  { %1805 = vmatprep.mubr.msk.f32.mxu0 %vm374_vm0, %v215_v24  ;;  %1865 = vmatprep.mubr.msk.f32.mxu1 %vm374_vm0, %v335_v25  ;;  %v238_v24 = vld [vmem:[%s3867_s0 + $0x340] sm:$0xff] }
  0xcc   :  { %v358_v25 = vld [vmem:[%s3867_s0 + $0x700] sm:$0xff] }
  0xce   :  { %1040 = vmatmul.mubr.f32.gmra.mxu0 %v214_v26  ;;  %1400 = vmatmul.mubr.f32.gmra.mxu1 %v334_v27 }
  0xcf   :  { %1806 = vmatprep.mubr.msk.f32.mxu0 %vm374_vm0, %v217_v28  ;;  %1866 = vmatprep.mubr.msk.f32.mxu1 %vm374_vm0, %v337_v29  ;;  %v241_v28 = vld [vmem:[%s3867_s0 + $0x358] sm:$0xff] }
  0xd0   :  { %v361_v29 = vld [vmem:[%s3867_s0 + $0x718] sm:$0xff] }
  0xd2   :  { %1046 = vmatmul.mubr.f32.gmra.mxu0 %v216_v30  ;;  %1406 = vmatmul.mubr.f32.gmra.mxu1 %v336_v31 }
  0xd3   :  { %1807 = vmatprep.mubr.msk.f32.mxu0 %vm374_vm0, %v219_v32  ;;  %1867 = vmatprep.mubr.msk.f32.mxu1 %vm374_vm0, %v339_v33  ;;  %v240_v32 = vld [vmem:[%s3867_s0 + $0x350] sm:$0xff] }
  0xd4   :  { %v360_v33 = vld [vmem:[%s3867_s0 + $0x710] sm:$0xff] }
  0xd6   :  { %1052 = vmatmul.mubr.f32.gmra.mxu0 %v218_v34  ;;  %1412 = vmatmul.mubr.f32.gmra.mxu1 %v338_v35 }
  0xd7   :  { %1808 = vmatprep.mubr.msk.f32.mxu0 %vm374_vm0, %v221_v36  ;;  %1868 = vmatprep.mubr.msk.f32.mxu1 %vm374_vm0, %v341_v37  ;;  %v243_v36 = vld [vmem:[%s3867_s0 + $0x368] sm:$0xff] }
  0xd8   :  { %v363_v37 = vld [vmem:[%s3867_s0 + $0x728] sm:$0xff] }
  0xda   :  { %1058 = vmatmul.mubr.f32.gmra.mxu0 %v220_v38  ;;  %1418 = vmatmul.mubr.f32.gmra.mxu1 %v340_v39 }
  0xdb   :  { %1809 = vmatprep.mubr.msk.f32.mxu0 %vm374_vm0, %v223_v40  ;;  %1869 = vmatprep.mubr.msk.f32.mxu1 %vm374_vm0, %v343_v41  ;;  %v242_v40 = vld [vmem:[%s3867_s0 + $0x360] sm:$0xff] }
  0xdc   :  { %v362_v41 = vld [vmem:[%s3867_s0 + $0x720] sm:$0xff] }
  0xde   :  { %1064 = vmatmul.mubr.f32.gmra.mxu0 %v222_v42  ;;  %1424 = vmatmul.mubr.f32.gmra.mxu1 %v342_v43 }
  0xdf   :  { %1810 = vmatprep.mubr.msk.f32.mxu0 %vm374_vm0, %v225_v44  ;;  %1870 = vmatprep.mubr.msk.f32.mxu1 %vm374_vm0, %v345_v45  ;;  %v245_v44 = vld [vmem:[%s3867_s0 + $0x378] sm:$0xff] }
  0xe0   :  { %v365_v45 = vld [vmem:[%s3867_s0 + $0x738] sm:$0xff] }
  0xe2   :  { %1070 = vmatmul.mubr.f32.gmra.mxu0 %v224_v46  ;;  %1430 = vmatmul.mubr.f32.gmra.mxu1 %v344_v47 }
  0xe3   :  { %1811 = vmatprep.mubr.msk.f32.mxu0 %vm374_vm0, %v227_v48  ;;  %1871 = vmatprep.mubr.msk.f32.mxu1 %vm374_vm0, %v347_v49  ;;  %v244_v48 = vld [vmem:[%s3867_s0 + $0x370] sm:$0xff] }
  0xe4   :  { %v364_v49 = vld [vmem:[%s3867_s0 + $0x730] sm:$0xff] }
  0xe6   :  { %1076 = vmatmul.mubr.f32.gmra.mxu0 %v226_v50  ;;  %1436 = vmatmul.mubr.f32.gmra.mxu1 %v346_v51 }
  0xe7   :  { %1812 = vmatprep.mubr.msk.f32.mxu0 %vm374_vm0, %v229_v52  ;;  %1872 = vmatprep.mubr.msk.f32.mxu1 %vm374_vm0, %v349_v53  ;;  %v247_v52 = vld [vmem:[%s3867_s0 + $0x388] sm:$0xff] }
  0xe8   :  { %v367_v53 = vld [vmem:[%s3867_s0 + $0x748] sm:$0xff] }
  0xea   :  { %1082 = vmatmul.mubr.f32.gmra.mxu0 %v228_v54  ;;  %1442 = vmatmul.mubr.f32.gmra.mxu1 %v348_v55 }
  0xeb   :  { %1813 = vmatprep.mubr.msk.f32.mxu0 %vm374_vm0, %v231_v56  ;;  %1873 = vmatprep.mubr.msk.f32.mxu1 %vm374_vm0, %v351_v57  ;;  %v246_v56 = vld [vmem:[%s3867_s0 + $0x380] sm:$0xff] }
  0xec   :  { %v366_v57 = vld [vmem:[%s3867_s0 + $0x740] sm:$0xff] }
  0xee   :  { %v801_v62 = vpop.f32.mrf.mxu0  ;;  %1088 = vmatmul.mubr.f32.gmra.mxu0 %v230_v58  ;;  %v1161_v63 = vpop.f32.mrf.mxu1  ;;  %1448 = vmatmul.mubr.f32.gmra.mxu1 %v350_v59 }
  0xef   :  { %1520 = vst [vmem:[%s3868_s3] sm:$0xff] %v801_v62  ;;  %1641 = vst [vmem:[%s3868_s3 + $0x3c0] sm:$0xff] %v1161_v63  ;;  %1814 = vmatprep.mubr.msk.f32.mxu0 %vm374_vm0, %v233_v60  ;;  %1874 = vmatprep.mubr.msk.f32.mxu1 %vm374_vm0, %v353_v61  ;;  %v249_v60 = vld [vmem:[%s3867_s0 + $0x398] sm:$0xff] }
  0xf0   :  { %v803_v2 = vpop.f32.mrf.mxu0  ;;  %v1163_v3 = vpop.f32.mrf.mxu1  ;;  %v369_v61 = vld [vmem:[%s3867_s0 + $0x758] sm:$0xff] }
  0xf1   :  { %1522 = vst.msk [vmem:[%s3868_s3 + $0x8] sm:$0xff] %vm1521_vm1, %v803_v2  ;;  %1642 = vst.msk [vmem:[%s3868_s3 + $0x3c8] sm:$0xff] %vm1521_vm1, %v1163_v3 }
  0xf2   :  { %v807_v6 = vpop.f32.mrf.mxu0  ;;  %1094 = vmatmul.mubr.f32.gmra.mxu0 %v232_v0  ;;  %v1167_v7 = vpop.f32.mrf.mxu1  ;;  %1454 = vmatmul.mubr.f32.gmra.mxu1 %v352_v1  ;;  %v248_v0 = vld [vmem:[%s3867_s0 + $0x390] sm:$0xff] }
  0xf3   :  { %1523 = vst [vmem:[%s3868_s3 + $0x10] sm:$0xff] %v807_v6  ;;  %1643 = vst [vmem:[%s3868_s3 + $0x3d0] sm:$0xff] %v1167_v7  ;;  %1815 = vmatprep.mubr.msk.f32.mxu0 %vm374_vm0, %v235_v4  ;;  %1875 = vmatprep.mubr.msk.f32.mxu1 %vm374_vm0, %v355_v5  ;;  %v368_v1 = vld [vmem:[%s3867_s0 + $0x750] sm:$0xff]  ;;  %v251_v4 = vld [vmem:[%s3867_s0 + $0x3a8] sm:$0xff] }
  0xf4   :  { %v809_v10 = vpop.f32.mrf.mxu0  ;;  %v1169_v11 = vpop.f32.mrf.mxu1  ;;  %v371_v5 = vld [vmem:[%s3867_s0 + $0x768] sm:$0xff] }
  0xf5   :  { %1524 = vst.msk [vmem:[%s3868_s3 + $0x18] sm:$0xff] %vm1521_vm1, %v809_v10  ;;  %1644 = vst.msk [vmem:[%s3868_s3 + $0x3d8] sm:$0xff] %vm1521_vm1, %v1169_v11 }
  0xf6   :  { %v813_v14 = vpop.f32.mrf.mxu0  ;;  %1100 = vmatmul.mubr.f32.gmra.mxu0 %v234_v8  ;;  %v1173_v15 = vpop.f32.mrf.mxu1  ;;  %1460 = vmatmul.mubr.f32.gmra.mxu1 %v354_v9  ;;  %v250_v8 = vld [vmem:[%s3867_s0 + $0x3a0] sm:$0xff] }
  0xf7   :  { %1525 = vst [vmem:[%s3868_s3 + $0x20] sm:$0xff] %v813_v14  ;;  %1645 = vst [vmem:[%s3868_s3 + $0x3e0] sm:$0xff] %v1173_v15  ;;  %1816 = vmatprep.mubr.msk.f32.mxu0 %vm374_vm0, %v237_v12  ;;  %1876 = vmatprep.mubr.msk.f32.mxu1 %vm374_vm0, %v357_v13  ;;  %v370_v9 = vld [vmem:[%s3867_s0 + $0x760] sm:$0xff]  ;;  %v253_v12 = vld [vmem:[%s3867_s0 + $0x3b8] sm:$0xff] }
  0xf8   :  { %v815_v18 = vpop.f32.mrf.mxu0  ;;  %v1175_v19 = vpop.f32.mrf.mxu1  ;;  %v373_v13 = vld [vmem:[%s3867_s0 + $0x778] sm:$0xff] }
  0xf9   :  { %1526 = vst.msk [vmem:[%s3868_s3 + $0x28] sm:$0xff] %vm1521_vm1, %v815_v18  ;;  %1646 = vst.msk [vmem:[%s3868_s3 + $0x3e8] sm:$0xff] %vm1521_vm1, %v1175_v19 }
  0xfa   :  { %v819_v22 = vpop.f32.mrf.mxu0  ;;  %1106 = vmatmul.mubr.f32.gmra.mxu0 %v236_v16  ;;  %v1179_v23 = vpop.f32.mrf.mxu1  ;;  %1466 = vmatmul.mubr.f32.gmra.mxu1 %v356_v17  ;;  %v252_v16 = vld [vmem:[%s3867_s0 + $0x3b0] sm:$0xff] }
  0xfb   :  { %1527 = vst [vmem:[%s3868_s3 + $0x30] sm:$0xff] %v819_v22  ;;  %1647 = vst [vmem:[%s3868_s3 + $0x3f0] sm:$0xff] %v1179_v23  ;;  %1817 = vmatprep.mubr.msk.f32.mxu0 %vm374_vm0, %v239_v20  ;;  %1877 = vmatprep.mubr.msk.f32.mxu1 %vm374_vm0, %v359_v21  ;;  %v372_v17 = vld [vmem:[%s3867_s0 + $0x770] sm:$0xff] }
  0xfc   :  { %v821_v26 = vpop.f32.mrf.mxu0  ;;  %v1181_v27 = vpop.f32.mrf.mxu1 }
  0xfd   :  { %1528 = vst.msk [vmem:[%s3868_s3 + $0x38] sm:$0xff] %vm1521_vm1, %v821_v26  ;;  %1648 = vst.msk [vmem:[%s3868_s3 + $0x3f8] sm:$0xff] %vm1521_vm1, %v1181_v27 }
  0xfe   :  { %v825_v30 = vpop.f32.mrf.mxu0  ;;  %1112 = vmatmul.mubr.f32.gmra.mxu0 %v238_v24  ;;  %v1185_v31 = vpop.f32.mrf.mxu1  ;;  %1472 = vmatmul.mubr.f32.gmra.mxu1 %v358_v25 }
  0xff   :  { %1529 = vst [vmem:[%s3868_s3 + $0x40] sm:$0xff] %v825_v30  ;;  %1649 = vst [vmem:[%s3868_s3 + $0x400] sm:$0xff] %v1185_v31  ;;  %1818 = vmatprep.mubr.msk.f32.mxu0 %vm374_vm0, %v241_v28  ;;  %1878 = vmatprep.mubr.msk.f32.mxu1 %vm374_vm0, %v361_v29 }
 0x100   :  { %v827_v34 = vpop.f32.mrf.mxu0  ;;  %v1187_v35 = vpop.f32.mrf.mxu1 }
 0x101   :  { %1530 = vst.msk [vmem:[%s3868_s3 + $0x48] sm:$0xff] %vm1521_vm1, %v827_v34  ;;  %1650 = vst.msk [vmem:[%s3868_s3 + $0x408] sm:$0xff] %vm1521_vm1, %v1187_v35 }
 0x102   :  { %v831_v38 = vpop.f32.mrf.mxu0  ;;  %1118 = vmatmul.mubr.f32.gmra.mxu0 %v240_v32  ;;  %v1191_v39 = vpop.f32.mrf.mxu1  ;;  %1478 = vmatmul.mubr.f32.gmra.mxu1 %v360_v33 }
 0x103   :  { %1531 = vst [vmem:[%s3868_s3 + $0x50] sm:$0xff] %v831_v38  ;;  %1651 = vst [vmem:[%s3868_s3 + $0x410] sm:$0xff] %v1191_v39  ;;  %1819 = vmatprep.mubr.msk.f32.mxu0 %vm374_vm0, %v243_v36  ;;  %1879 = vmatprep.mubr.msk.f32.mxu1 %vm374_vm0, %v363_v37 }
 0x104   :  { %v833_v42 = vpop.f32.mrf.mxu0  ;;  %v1193_v43 = vpop.f32.mrf.mxu1 }
 0x105   :  { %1532 = vst.msk [vmem:[%s3868_s3 + $0x58] sm:$0xff] %vm1521_vm1, %v833_v42  ;;  %1652 = vst.msk [vmem:[%s3868_s3 + $0x418] sm:$0xff] %vm1521_vm1, %v1193_v43 }
 0x106   :  { %v837_v46 = vpop.f32.mrf.mxu0  ;;  %1124 = vmatmul.mubr.f32.gmra.mxu0 %v242_v40  ;;  %v1197_v47 = vpop.f32.mrf.mxu1  ;;  %1484 = vmatmul.mubr.f32.gmra.mxu1 %v362_v41 }
 0x107   :  { %1533 = vst [vmem:[%s3868_s3 + $0x60] sm:$0xff] %v837_v46  ;;  %1653 = vst [vmem:[%s3868_s3 + $0x420] sm:$0xff] %v1197_v47  ;;  %1820 = vmatprep.mubr.msk.f32.mxu0 %vm374_vm0, %v245_v44  ;;  %1880 = vmatprep.mubr.msk.f32.mxu1 %vm374_vm0, %v365_v45 }
 0x108   :  { %v839_v50 = vpop.f32.mrf.mxu0  ;;  %v1199_v51 = vpop.f32.mrf.mxu1 }
 0x109   :  { %1534 = vst.msk [vmem:[%s3868_s3 + $0x68] sm:$0xff] %vm1521_vm1, %v839_v50  ;;  %1654 = vst.msk [vmem:[%s3868_s3 + $0x428] sm:$0xff] %vm1521_vm1, %v1199_v51 }
 0x10a   :  { %v843_v54 = vpop.f32.mrf.mxu0  ;;  %1130 = vmatmul.mubr.f32.gmra.mxu0 %v244_v48  ;;  %v1203_v55 = vpop.f32.mrf.mxu1  ;;  %1490 = vmatmul.mubr.f32.gmra.mxu1 %v364_v49 }
 0x10b   :  { %1535 = vst [vmem:[%s3868_s3 + $0x70] sm:$0xff] %v843_v54  ;;  %1655 = vst [vmem:[%s3868_s3 + $0x430] sm:$0xff] %v1203_v55  ;;  %1821 = vmatprep.mubr.msk.f32.mxu0 %vm374_vm0, %v247_v52  ;;  %1881 = vmatprep.mubr.msk.f32.mxu1 %vm374_vm0, %v367_v53 }
 0x10c   :  { %v845_v58 = vpop.f32.mrf.mxu0  ;;  %v1205_v59 = vpop.f32.mrf.mxu1 }
 0x10d   :  { %1536 = vst.msk [vmem:[%s3868_s3 + $0x78] sm:$0xff] %vm1521_vm1, %v845_v58  ;;  %1656 = vst.msk [vmem:[%s3868_s3 + $0x438] sm:$0xff] %vm1521_vm1, %v1205_v59 }
 0x10e   :  { %v849_v62 = vpop.f32.mrf.mxu0  ;;  %1136 = vmatmul.mubr.f32.gmra.mxu0 %v246_v56  ;;  %v1209_v63 = vpop.f32.mrf.mxu1  ;;  %1496 = vmatmul.mubr.f32.gmra.mxu1 %v366_v57 }
 0x10f   :  { %1537 = vst [vmem:[%s3868_s3 + $0x80] sm:$0xff] %v849_v62  ;;  %1657 = vst [vmem:[%s3868_s3 + $0x440] sm:$0xff] %v1209_v63  ;;  %1822 = vmatprep.mubr.msk.f32.mxu0 %vm374_vm0, %v249_v60  ;;  %1882 = vmatprep.mubr.msk.f32.mxu1 %vm374_vm0, %v369_v61 }
 0x110   :  { %v851_v2 = vpop.f32.mrf.mxu0  ;;  %v1211_v3 = vpop.f32.mrf.mxu1 }
 0x111   :  { %1538 = vst.msk [vmem:[%s3868_s3 + $0x88] sm:$0xff] %vm1521_vm1, %v851_v2  ;;  %1658 = vst.msk [vmem:[%s3868_s3 + $0x448] sm:$0xff] %vm1521_vm1, %v1211_v3 }
 0x112   :  { %v855_v6 = vpop.f32.mrf.mxu0  ;;  %1142 = vmatmul.mubr.f32.gmra.mxu0 %v248_v0  ;;  %v1215_v7 = vpop.f32.mrf.mxu1  ;;  %1502 = vmatmul.mubr.f32.gmra.mxu1 %v368_v1 }
 0x113   :  { %1539 = vst [vmem:[%s3868_s3 + $0x90] sm:$0xff] %v855_v6  ;;  %1659 = vst [vmem:[%s3868_s3 + $0x450] sm:$0xff] %v1215_v7  ;;  %1823 = vmatprep.mubr.msk.f32.mxu0 %vm374_vm0, %v251_v4  ;;  %1883 = vmatprep.mubr.msk.f32.mxu1 %vm374_vm0, %v371_v5 }
 0x114   :  { %v857_v10 = vpop.f32.mrf.mxu0  ;;  %v1217_v11 = vpop.f32.mrf.mxu1 }
 0x115   :  { %1540 = vst.msk [vmem:[%s3868_s3 + $0x98] sm:$0xff] %vm1521_vm1, %v857_v10  ;;  %1660 = vst.msk [vmem:[%s3868_s3 + $0x458] sm:$0xff] %vm1521_vm1, %v1217_v11 }
 0x116   :  { %v861_v14 = vpop.f32.mrf.mxu0  ;;  %1148 = vmatmul.mubr.f32.gmra.mxu0 %v250_v8  ;;  %v1221_v15 = vpop.f32.mrf.mxu1  ;;  %1508 = vmatmul.mubr.f32.gmra.mxu1 %v370_v9 }
 0x117   :  { %1541 = vst [vmem:[%s3868_s3 + $0xa0] sm:$0xff] %v861_v14  ;;  %1661 = vst [vmem:[%s3868_s3 + $0x460] sm:$0xff] %v1221_v15  ;;  %1824 = vmatprep.mubr.msk.f32.mxu0 %vm374_vm0, %v253_v12  ;;  %1884 = vmatprep.mubr.msk.f32.mxu1 %vm374_vm0, %v373_v13 }
 0x118   :  { %v863_v18 = vpop.f32.mrf.mxu0  ;;  %v1223_v19 = vpop.f32.mrf.mxu1 }
 0x119   :  { %1542 = vst.msk [vmem:[%s3868_s3 + $0xa8] sm:$0xff] %vm1521_vm1, %v863_v18  ;;  %1662 = vst.msk [vmem:[%s3868_s3 + $0x468] sm:$0xff] %vm1521_vm1, %v1223_v19 }
 0x11a   :  { %v867_v20 = vpop.f32.mrf.mxu0  ;;  %1154 = vmatmul.mubr.f32.gmra.mxu0 %v252_v16  ;;  %v1227_v21 = vpop.f32.mrf.mxu1  ;;  %1514 = vmatmul.mubr.f32.gmra.mxu1 %v372_v17 }
 0x11b   :  { %1543 = vst [vmem:[%s3868_s3 + $0xb0] sm:$0xff] %v867_v20  ;;  %1663 = vst [vmem:[%s3868_s3 + $0x470] sm:$0xff] %v1227_v21 }
 0x11c   :  { %v869_v22 = vpop.f32.mrf.mxu0  ;;  %v1229_v23 = vpop.f32.mrf.mxu1 }
 0x11d   :  { %1544 = vst.msk [vmem:[%s3868_s3 + $0xb8] sm:$0xff] %vm1521_vm1, %v869_v22  ;;  %1664 = vst.msk [vmem:[%s3868_s3 + $0x478] sm:$0xff] %vm1521_vm1, %v1229_v23 }
 0x11e   :  { %v873_v24 = vpop.f32.mrf.mxu0  ;;  %v1233_v25 = vpop.f32.mrf.mxu1 }
 0x11f   :  { %1545 = vst [vmem:[%s3868_s3 + $0xc0] sm:$0xff] %v873_v24  ;;  %1665 = vst [vmem:[%s3868_s3 + $0x480] sm:$0xff] %v1233_v25 }
 0x120   :  { %v875_v26 = vpop.f32.mrf.mxu0  ;;  %v1235_v27 = vpop.f32.mrf.mxu1 }
 0x121   :  { %1546 = vst.msk [vmem:[%s3868_s3 + $0xc8] sm:$0xff] %vm1521_vm1, %v875_v26  ;;  %1666 = vst.msk [vmem:[%s3868_s3 + $0x488] sm:$0xff] %vm1521_vm1, %v1235_v27 }
 0x122   :  { %v879_v28 = vpop.f32.mrf.mxu0  ;;  %v1239_v29 = vpop.f32.mrf.mxu1 }
 0x123   :  { %1547 = vst [vmem:[%s3868_s3 + $0xd0] sm:$0xff] %v879_v28  ;;  %1667 = vst [vmem:[%s3868_s3 + $0x490] sm:$0xff] %v1239_v29 }
 0x124   :  { %v881_v30 = vpop.f32.mrf.mxu0  ;;  %v1241_v31 = vpop.f32.mrf.mxu1 }
 0x125   :  { %1548 = vst.msk [vmem:[%s3868_s3 + $0xd8] sm:$0xff] %vm1521_vm1, %v881_v30  ;;  %1668 = vst.msk [vmem:[%s3868_s3 + $0x498] sm:$0xff] %vm1521_vm1, %v1241_v31 }
 0x126   :  { %v885_v32 = vpop.f32.mrf.mxu0  ;;  %v1245_v33 = vpop.f32.mrf.mxu1 }
 0x127   :  { %1549 = vst [vmem:[%s3868_s3 + $0xe0] sm:$0xff] %v885_v32  ;;  %1669 = vst [vmem:[%s3868_s3 + $0x4a0] sm:$0xff] %v1245_v33 }
 0x128   :  { %v887_v34 = vpop.f32.mrf.mxu0  ;;  %v1247_v35 = vpop.f32.mrf.mxu1 }
 0x129   :  { %1550 = vst.msk [vmem:[%s3868_s3 + $0xe8] sm:$0xff] %vm1521_vm1, %v887_v34  ;;  %1670 = vst.msk [vmem:[%s3868_s3 + $0x4a8] sm:$0xff] %vm1521_vm1, %v1247_v35 }
 0x12a   :  { %v891_v36 = vpop.f32.mrf.mxu0  ;;  %v1251_v37 = vpop.f32.mrf.mxu1 }
 0x12b   :  { %1551 = vst [vmem:[%s3868_s3 + $0xf0] sm:$0xff] %v891_v36  ;;  %1671 = vst [vmem:[%s3868_s3 + $0x4b0] sm:$0xff] %v1251_v37 }
 0x12c   :  { %v893_v38 = vpop.f32.mrf.mxu0  ;;  %v1253_v39 = vpop.f32.mrf.mxu1 }
 0x12d   :  { %1552 = vst.msk [vmem:[%s3868_s3 + $0xf8] sm:$0xff] %vm1521_vm1, %v893_v38  ;;  %1672 = vst.msk [vmem:[%s3868_s3 + $0x4b8] sm:$0xff] %vm1521_vm1, %v1253_v39 }
 0x12e   :  { %v897_v40 = vpop.f32.mrf.mxu0  ;;  %v1257_v41 = vpop.f32.mrf.mxu1 }
 0x12f   :  { %1553 = vst [vmem:[%s3868_s3 + $0x100] sm:$0xff] %v897_v40  ;;  %1673 = vst [vmem:[%s3868_s3 + $0x4c0] sm:$0xff] %v1257_v41 }
 0x130   :  { %v899_v42 = vpop.f32.mrf.mxu0  ;;  %v1259_v43 = vpop.f32.mrf.mxu1 }
 0x131   :  { %1554 = vst.msk [vmem:[%s3868_s3 + $0x108] sm:$0xff] %vm1521_vm1, %v899_v42  ;;  %1674 = vst.msk [vmem:[%s3868_s3 + $0x4c8] sm:$0xff] %vm1521_vm1, %v1259_v43 }
 0x132   :  { %v903_v44 = vpop.f32.mrf.mxu0  ;;  %v1263_v45 = vpop.f32.mrf.mxu1 }
 0x133   :  { %1555 = vst [vmem:[%s3868_s3 + $0x110] sm:$0xff] %v903_v44  ;;  %1675 = vst [vmem:[%s3868_s3 + $0x4d0] sm:$0xff] %v1263_v45 }
 0x134   :  { %v905_v46 = vpop.f32.mrf.mxu0  ;;  %v1265_v47 = vpop.f32.mrf.mxu1 }
 0x135   :  { %1556 = vst.msk [vmem:[%s3868_s3 + $0x118] sm:$0xff] %vm1521_vm1, %v905_v46  ;;  %1676 = vst.msk [vmem:[%s3868_s3 + $0x4d8] sm:$0xff] %vm1521_vm1, %v1265_v47 }
 0x136   :  { %v909_v48 = vpop.f32.mrf.mxu0  ;;  %v1269_v49 = vpop.f32.mrf.mxu1 }
 0x137   :  { %1557 = vst [vmem:[%s3868_s3 + $0x120] sm:$0xff] %v909_v48  ;;  %1677 = vst [vmem:[%s3868_s3 + $0x4e0] sm:$0xff] %v1269_v49 }
 0x138   :  { %v911_v50 = vpop.f32.mrf.mxu0  ;;  %v1271_v51 = vpop.f32.mrf.mxu1 }
 0x139   :  { %1558 = vst.msk [vmem:[%s3868_s3 + $0x128] sm:$0xff] %vm1521_vm1, %v911_v50  ;;  %1678 = vst.msk [vmem:[%s3868_s3 + $0x4e8] sm:$0xff] %vm1521_vm1, %v1271_v51 }
 0x13a   :  { %v915_v52 = vpop.f32.mrf.mxu0  ;;  %v1275_v53 = vpop.f32.mrf.mxu1 }
 0x13b   :  { %1559 = vst [vmem:[%s3868_s3 + $0x130] sm:$0xff] %v915_v52  ;;  %1679 = vst [vmem:[%s3868_s3 + $0x4f0] sm:$0xff] %v1275_v53 }
 0x13c   :  { %v917_v54 = vpop.f32.mrf.mxu0  ;;  %v1277_v55 = vpop.f32.mrf.mxu1 }
 0x13d   :  { %1560 = vst.msk [vmem:[%s3868_s3 + $0x138] sm:$0xff] %vm1521_vm1, %v917_v54  ;;  %1680 = vst.msk [vmem:[%s3868_s3 + $0x4f8] sm:$0xff] %vm1521_vm1, %v1277_v55 }
 0x13e   :  { %v921_v56 = vpop.f32.mrf.mxu0  ;;  %v1281_v57 = vpop.f32.mrf.mxu1 }
 0x13f   :  { %1561 = vst [vmem:[%s3868_s3 + $0x140] sm:$0xff] %v921_v56  ;;  %1681 = vst [vmem:[%s3868_s3 + $0x500] sm:$0xff] %v1281_v57 }
 0x140   :  { %v923_v58 = vpop.f32.mrf.mxu0  ;;  %v1283_v59 = vpop.f32.mrf.mxu1 }
 0x141   :  { %1562 = vst.msk [vmem:[%s3868_s3 + $0x148] sm:$0xff] %vm1521_vm1, %v923_v58  ;;  %1682 = vst.msk [vmem:[%s3868_s3 + $0x508] sm:$0xff] %vm1521_vm1, %v1283_v59 }
 0x142   :  { %v927_v60 = vpop.f32.mrf.mxu0  ;;  %v1287_v61 = vpop.f32.mrf.mxu1 }
 0x143   :  { %1563 = vst [vmem:[%s3868_s3 + $0x150] sm:$0xff] %v927_v60  ;;  %1683 = vst [vmem:[%s3868_s3 + $0x510] sm:$0xff] %v1287_v61 }
 0x144   :  { %v929_v62 = vpop.f32.mrf.mxu0  ;;  %v1289_v63 = vpop.f32.mrf.mxu1 }
 0x145   :  { %1564 = vst.msk [vmem:[%s3868_s3 + $0x158] sm:$0xff] %vm1521_vm1, %v929_v62  ;;  %1684 = vst.msk [vmem:[%s3868_s3 + $0x518] sm:$0xff] %vm1521_vm1, %v1289_v63 }
 0x146   :  { %v933_v0 = vpop.f32.mrf.mxu0  ;;  %v1293_v1 = vpop.f32.mrf.mxu1 }
 0x147   :  { %1565 = vst [vmem:[%s3868_s3 + $0x160] sm:$0xff] %v933_v0  ;;  %1685 = vst [vmem:[%s3868_s3 + $0x520] sm:$0xff] %v1293_v1 }
 0x148   :  { %v935_v2 = vpop.f32.mrf.mxu0  ;;  %v1295_v3 = vpop.f32.mrf.mxu1 }
 0x149   :  { %1566 = vst.msk [vmem:[%s3868_s3 + $0x168] sm:$0xff] %vm1521_vm1, %v935_v2  ;;  %1686 = vst.msk [vmem:[%s3868_s3 + $0x528] sm:$0xff] %vm1521_vm1, %v1295_v3 }
 0x14a   :  { %v939_v4 = vpop.f32.mrf.mxu0  ;;  %v1299_v5 = vpop.f32.mrf.mxu1 }
 0x14b   :  { %1567 = vst [vmem:[%s3868_s3 + $0x170] sm:$0xff] %v939_v4  ;;  %1687 = vst [vmem:[%s3868_s3 + $0x530] sm:$0xff] %v1299_v5 }
 0x14c   :  { %v941_v6 = vpop.f32.mrf.mxu0  ;;  %v1301_v7 = vpop.f32.mrf.mxu1 }
 0x14d   :  { %1568 = vst.msk [vmem:[%s3868_s3 + $0x178] sm:$0xff] %vm1521_vm1, %v941_v6  ;;  %1688 = vst.msk [vmem:[%s3868_s3 + $0x538] sm:$0xff] %vm1521_vm1, %v1301_v7 }
 0x14e   :  { %v945_v8 = vpop.f32.mrf.mxu0  ;;  %v1305_v9 = vpop.f32.mrf.mxu1 }
 0x14f   :  { %1569 = vst [vmem:[%s3868_s3 + $0x180] sm:$0xff] %v945_v8  ;;  %1689 = vst [vmem:[%s3868_s3 + $0x540] sm:$0xff] %v1305_v9 }
 0x150   :  { %v947_v10 = vpop.f32.mrf.mxu0  ;;  %v1307_v11 = vpop.f32.mrf.mxu1 }
 0x151   :  { %1570 = vst.msk [vmem:[%s3868_s3 + $0x188] sm:$0xff] %vm1521_vm1, %v947_v10  ;;  %1690 = vst.msk [vmem:[%s3868_s3 + $0x548] sm:$0xff] %vm1521_vm1, %v1307_v11 }
 0x152   :  { %v951_v12 = vpop.f32.mrf.mxu0  ;;  %v1311_v13 = vpop.f32.mrf.mxu1 }
 0x153   :  { %1571 = vst [vmem:[%s3868_s3 + $0x190] sm:$0xff] %v951_v12  ;;  %1691 = vst [vmem:[%s3868_s3 + $0x550] sm:$0xff] %v1311_v13 }
 0x154   :  { %v953_v14 = vpop.f32.mrf.mxu0  ;;  %v1313_v15 = vpop.f32.mrf.mxu1 }
 0x155   :  { %1572 = vst.msk [vmem:[%s3868_s3 + $0x198] sm:$0xff] %vm1521_vm1, %v953_v14  ;;  %1692 = vst.msk [vmem:[%s3868_s3 + $0x558] sm:$0xff] %vm1521_vm1, %v1313_v15 }
 0x156   :  { %v957_v16 = vpop.f32.mrf.mxu0  ;;  %v1317_v17 = vpop.f32.mrf.mxu1 }
 0x157   :  { %1573 = vst [vmem:[%s3868_s3 + $0x1a0] sm:$0xff] %v957_v16  ;;  %1693 = vst [vmem:[%s3868_s3 + $0x560] sm:$0xff] %v1317_v17 }
 0x158   :  { %v959_v18 = vpop.f32.mrf.mxu0  ;;  %v1319_v19 = vpop.f32.mrf.mxu1 }
 0x159   :  { %1574 = vst.msk [vmem:[%s3868_s3 + $0x1a8] sm:$0xff] %vm1521_vm1, %v959_v18  ;;  %1694 = vst.msk [vmem:[%s3868_s3 + $0x568] sm:$0xff] %vm1521_vm1, %v1319_v19 }
 0x15a   :  { %v963_v20 = vpop.f32.mrf.mxu0  ;;  %v1323_v21 = vpop.f32.mrf.mxu1 }
 0x15b   :  { %1575 = vst [vmem:[%s3868_s3 + $0x1b0] sm:$0xff] %v963_v20  ;;  %1695 = vst [vmem:[%s3868_s3 + $0x570] sm:$0xff] %v1323_v21 }
 0x15c   :  { %v965_v22 = vpop.f32.mrf.mxu0  ;;  %v1325_v23 = vpop.f32.mrf.mxu1 }
 0x15d   :  { %1576 = vst.msk [vmem:[%s3868_s3 + $0x1b8] sm:$0xff] %vm1521_vm1, %v965_v22  ;;  %1696 = vst.msk [vmem:[%s3868_s3 + $0x578] sm:$0xff] %vm1521_vm1, %v1325_v23 }
 0x15e   :  { %v969_v24 = vpop.f32.mrf.mxu0  ;;  %v1329_v25 = vpop.f32.mrf.mxu1 }
 0x15f   :  { %1577 = vst [vmem:[%s3868_s3 + $0x1c0] sm:$0xff] %v969_v24  ;;  %1697 = vst [vmem:[%s3868_s3 + $0x580] sm:$0xff] %v1329_v25 }
 0x160   :  { %v971_v26 = vpop.f32.mrf.mxu0  ;;  %v1331_v27 = vpop.f32.mrf.mxu1 }
 0x161   :  { %1578 = vst.msk [vmem:[%s3868_s3 + $0x1c8] sm:$0xff] %vm1521_vm1, %v971_v26  ;;  %1698 = vst.msk [vmem:[%s3868_s3 + $0x588] sm:$0xff] %vm1521_vm1, %v1331_v27 }
 0x162   :  { %v975_v28 = vpop.f32.mrf.mxu0  ;;  %v1335_v29 = vpop.f32.mrf.mxu1 }
 0x163   :  { %1579 = vst [vmem:[%s3868_s3 + $0x1d0] sm:$0xff] %v975_v28  ;;  %1699 = vst [vmem:[%s3868_s3 + $0x590] sm:$0xff] %v1335_v29 }
 0x164   :  { %v977_v30 = vpop.f32.mrf.mxu0  ;;  %v1337_v31 = vpop.f32.mrf.mxu1 }
 0x165   :  { %1580 = vst.msk [vmem:[%s3868_s3 + $0x1d8] sm:$0xff] %vm1521_vm1, %v977_v30  ;;  %1700 = vst.msk [vmem:[%s3868_s3 + $0x598] sm:$0xff] %vm1521_vm1, %v1337_v31 }
 0x166   :  { %v981_v32 = vpop.f32.mrf.mxu0  ;;  %v1341_v33 = vpop.f32.mrf.mxu1 }
 0x167   :  { %1581 = vst [vmem:[%s3868_s3 + $0x1e0] sm:$0xff] %v981_v32  ;;  %1701 = vst [vmem:[%s3868_s3 + $0x5a0] sm:$0xff] %v1341_v33 }
 0x168   :  { %v983_v34 = vpop.f32.mrf.mxu0  ;;  %v1343_v35 = vpop.f32.mrf.mxu1 }
 0x169   :  { %1582 = vst.msk [vmem:[%s3868_s3 + $0x1e8] sm:$0xff] %vm1521_vm1, %v983_v34  ;;  %1702 = vst.msk [vmem:[%s3868_s3 + $0x5a8] sm:$0xff] %vm1521_vm1, %v1343_v35 }
 0x16a   :  { %v987_v36 = vpop.f32.mrf.mxu0  ;;  %v1347_v37 = vpop.f32.mrf.mxu1 }
 0x16b   :  { %1583 = vst [vmem:[%s3868_s3 + $0x1f0] sm:$0xff] %v987_v36  ;;  %1703 = vst [vmem:[%s3868_s3 + $0x5b0] sm:$0xff] %v1347_v37 }
 0x16c   :  { %v989_v38 = vpop.f32.mrf.mxu0  ;;  %v1349_v39 = vpop.f32.mrf.mxu1 }
 0x16d   :  { %1584 = vst.msk [vmem:[%s3868_s3 + $0x1f8] sm:$0xff] %vm1521_vm1, %v989_v38  ;;  %1704 = vst.msk [vmem:[%s3868_s3 + $0x5b8] sm:$0xff] %vm1521_vm1, %v1349_v39 }
 0x16e   :  { %v993_v40 = vpop.f32.mrf.mxu0  ;;  %v1353_v41 = vpop.f32.mrf.mxu1 }
 0x16f   :  { %1585 = vst [vmem:[%s3868_s3 + $0x200] sm:$0xff] %v993_v40  ;;  %1705 = vst [vmem:[%s3868_s3 + $0x5c0] sm:$0xff] %v1353_v41 }
 0x170   :  { %v995_v42 = vpop.f32.mrf.mxu0  ;;  %v1355_v43 = vpop.f32.mrf.mxu1 }
 0x171   :  { %1586 = vst.msk [vmem:[%s3868_s3 + $0x208] sm:$0xff] %vm1521_vm1, %v995_v42  ;;  %1706 = vst.msk [vmem:[%s3868_s3 + $0x5c8] sm:$0xff] %vm1521_vm1, %v1355_v43 }
 0x172   :  { %v999_v44 = vpop.f32.mrf.mxu0  ;;  %v1359_v45 = vpop.f32.mrf.mxu1 }
 0x173   :  { %1587 = vst [vmem:[%s3868_s3 + $0x210] sm:$0xff] %v999_v44  ;;  %1707 = vst [vmem:[%s3868_s3 + $0x5d0] sm:$0xff] %v1359_v45 }
 0x174   :  { %v1001_v46 = vpop.f32.mrf.mxu0  ;;  %v1361_v47 = vpop.f32.mrf.mxu1 }
 0x175   :  { %1588 = vst.msk [vmem:[%s3868_s3 + $0x218] sm:$0xff] %vm1521_vm1, %v1001_v46  ;;  %1708 = vst.msk [vmem:[%s3868_s3 + $0x5d8] sm:$0xff] %vm1521_vm1, %v1361_v47 }
 0x176   :  { %v1005_v48 = vpop.f32.mrf.mxu0  ;;  %v1365_v49 = vpop.f32.mrf.mxu1 }
 0x177   :  { %1589 = vst [vmem:[%s3868_s3 + $0x220] sm:$0xff] %v1005_v48  ;;  %1709 = vst [vmem:[%s3868_s3 + $0x5e0] sm:$0xff] %v1365_v49 }
 0x178   :  { %v1007_v50 = vpop.f32.mrf.mxu0  ;;  %v1367_v51 = vpop.f32.mrf.mxu1 }
 0x179   :  { %1590 = vst.msk [vmem:[%s3868_s3 + $0x228] sm:$0xff] %vm1521_vm1, %v1007_v50  ;;  %1710 = vst.msk [vmem:[%s3868_s3 + $0x5e8] sm:$0xff] %vm1521_vm1, %v1367_v51 }
 0x17a   :  { %v1011_v52 = vpop.f32.mrf.mxu0  ;;  %v1371_v53 = vpop.f32.mrf.mxu1 }
 0x17b   :  { %1591 = vst [vmem:[%s3868_s3 + $0x230] sm:$0xff] %v1011_v52  ;;  %1711 = vst [vmem:[%s3868_s3 + $0x5f0] sm:$0xff] %v1371_v53 }
 0x17c   :  { %v1013_v54 = vpop.f32.mrf.mxu0  ;;  %v1373_v55 = vpop.f32.mrf.mxu1 }
 0x17d   :  { %1592 = vst.msk [vmem:[%s3868_s3 + $0x238] sm:$0xff] %vm1521_vm1, %v1013_v54  ;;  %1712 = vst.msk [vmem:[%s3868_s3 + $0x5f8] sm:$0xff] %vm1521_vm1, %v1373_v55 }
 0x17e   :  { %v1017_v56 = vpop.f32.mrf.mxu0  ;;  %v1377_v57 = vpop.f32.mrf.mxu1 }
 0x17f   :  { %1593 = vst [vmem:[%s3868_s3 + $0x240] sm:$0xff] %v1017_v56  ;;  %1713 = vst [vmem:[%s3868_s3 + $0x600] sm:$0xff] %v1377_v57 }
 0x180   :  { %v1019_v58 = vpop.f32.mrf.mxu0  ;;  %v1379_v59 = vpop.f32.mrf.mxu1 }
 0x181   :  { %1594 = vst.msk [vmem:[%s3868_s3 + $0x248] sm:$0xff] %vm1521_vm1, %v1019_v58  ;;  %1714 = vst.msk [vmem:[%s3868_s3 + $0x608] sm:$0xff] %vm1521_vm1, %v1379_v59 }
 0x182   :  { %v1023_v60 = vpop.f32.mrf.mxu0  ;;  %v1383_v61 = vpop.f32.mrf.mxu1 }
 0x183   :  { %1595 = vst [vmem:[%s3868_s3 + $0x250] sm:$0xff] %v1023_v60  ;;  %1715 = vst [vmem:[%s3868_s3 + $0x610] sm:$0xff] %v1383_v61 }
 0x184   :  { %v1025_v62 = vpop.f32.mrf.mxu0  ;;  %v1385_v63 = vpop.f32.mrf.mxu1 }
 0x185   :  { %1596 = vst.msk [vmem:[%s3868_s3 + $0x258] sm:$0xff] %vm1521_vm1, %v1025_v62  ;;  %1716 = vst.msk [vmem:[%s3868_s3 + $0x618] sm:$0xff] %vm1521_vm1, %v1385_v63 }
 0x186   :  { %v1029_v0 = vpop.f32.mrf.mxu0  ;;  %v1389_v1 = vpop.f32.mrf.mxu1 }
 0x187   :  { %1597 = vst [vmem:[%s3868_s3 + $0x260] sm:$0xff] %v1029_v0  ;;  %1717 = vst [vmem:[%s3868_s3 + $0x620] sm:$0xff] %v1389_v1 }
 0x188   :  { %v1031_v2 = vpop.f32.mrf.mxu0  ;;  %v1391_v3 = vpop.f32.mrf.mxu1 }
 0x189   :  { %1598 = vst.msk [vmem:[%s3868_s3 + $0x268] sm:$0xff] %vm1521_vm1, %v1031_v2  ;;  %1718 = vst.msk [vmem:[%s3868_s3 + $0x628] sm:$0xff] %vm1521_vm1, %v1391_v3 }
 0x18a   :  { %v1035_v4 = vpop.f32.mrf.mxu0  ;;  %v1395_v5 = vpop.f32.mrf.mxu1 }
 0x18b   :  { %1599 = vst [vmem:[%s3868_s3 + $0x270] sm:$0xff] %v1035_v4  ;;  %1719 = vst [vmem:[%s3868_s3 + $0x630] sm:$0xff] %v1395_v5 }
 0x18c   :  { %v1037_v6 = vpop.f32.mrf.mxu0  ;;  %v1397_v7 = vpop.f32.mrf.mxu1 }
 0x18d   :  { %1600 = vst.msk [vmem:[%s3868_s3 + $0x278] sm:$0xff] %vm1521_vm1, %v1037_v6  ;;  %1720 = vst.msk [vmem:[%s3868_s3 + $0x638] sm:$0xff] %vm1521_vm1, %v1397_v7 }
 0x18e   :  { %v1041_v8 = vpop.f32.mrf.mxu0  ;;  %v1401_v9 = vpop.f32.mrf.mxu1 }
 0x18f   :  { %1601 = vst [vmem:[%s3868_s3 + $0x280] sm:$0xff] %v1041_v8  ;;  %1721 = vst [vmem:[%s3868_s3 + $0x640] sm:$0xff] %v1401_v9 }
 0x190   :  { %v1043_v10 = vpop.f32.mrf.mxu0  ;;  %v1403_v11 = vpop.f32.mrf.mxu1 }
 0x191   :  { %1602 = vst.msk [vmem:[%s3868_s3 + $0x288] sm:$0xff] %vm1521_vm1, %v1043_v10  ;;  %1722 = vst.msk [vmem:[%s3868_s3 + $0x648] sm:$0xff] %vm1521_vm1, %v1403_v11 }
 0x192   :  { %v1047_v12 = vpop.f32.mrf.mxu0  ;;  %v1407_v13 = vpop.f32.mrf.mxu1 }
 0x193   :  { %1603 = vst [vmem:[%s3868_s3 + $0x290] sm:$0xff] %v1047_v12  ;;  %1723 = vst [vmem:[%s3868_s3 + $0x650] sm:$0xff] %v1407_v13 }
 0x194   :  { %v1049_v14 = vpop.f32.mrf.mxu0  ;;  %v1409_v15 = vpop.f32.mrf.mxu1 }
 0x195   :  { %1604 = vst.msk [vmem:[%s3868_s3 + $0x298] sm:$0xff] %vm1521_vm1, %v1049_v14  ;;  %1724 = vst.msk [vmem:[%s3868_s3 + $0x658] sm:$0xff] %vm1521_vm1, %v1409_v15 }
 0x196   :  { %v1053_v16 = vpop.f32.mrf.mxu0  ;;  %v1413_v17 = vpop.f32.mrf.mxu1 }
 0x197   :  { %1605 = vst [vmem:[%s3868_s3 + $0x2a0] sm:$0xff] %v1053_v16  ;;  %1725 = vst [vmem:[%s3868_s3 + $0x660] sm:$0xff] %v1413_v17 }
 0x198   :  { %v1055_v18 = vpop.f32.mrf.mxu0  ;;  %v1415_v19 = vpop.f32.mrf.mxu1 }
 0x199   :  { %1606 = vst.msk [vmem:[%s3868_s3 + $0x2a8] sm:$0xff] %vm1521_vm1, %v1055_v18  ;;  %1726 = vst.msk [vmem:[%s3868_s3 + $0x668] sm:$0xff] %vm1521_vm1, %v1415_v19 }
 0x19a   :  { %v1059_v20 = vpop.f32.mrf.mxu0  ;;  %v1419_v21 = vpop.f32.mrf.mxu1 }
 0x19b   :  { %1607 = vst [vmem:[%s3868_s3 + $0x2b0] sm:$0xff] %v1059_v20  ;;  %1727 = vst [vmem:[%s3868_s3 + $0x670] sm:$0xff] %v1419_v21 }
 0x19c   :  { %v1061_v22 = vpop.f32.mrf.mxu0  ;;  %v1421_v23 = vpop.f32.mrf.mxu1 }
 0x19d   :  { %1608 = vst.msk [vmem:[%s3868_s3 + $0x2b8] sm:$0xff] %vm1521_vm1, %v1061_v22  ;;  %1728 = vst.msk [vmem:[%s3868_s3 + $0x678] sm:$0xff] %vm1521_vm1, %v1421_v23 }
 0x19e   :  { %v1065_v24 = vpop.f32.mrf.mxu0  ;;  %v1425_v25 = vpop.f32.mrf.mxu1 }
 0x19f   :  { %1609 = vst [vmem:[%s3868_s3 + $0x2c0] sm:$0xff] %v1065_v24  ;;  %1729 = vst [vmem:[%s3868_s3 + $0x680] sm:$0xff] %v1425_v25 }
 0x1a0   :  { %v1067_v26 = vpop.f32.mrf.mxu0  ;;  %v1427_v27 = vpop.f32.mrf.mxu1 }
 0x1a1   :  { %1610 = vst.msk [vmem:[%s3868_s3 + $0x2c8] sm:$0xff] %vm1521_vm1, %v1067_v26  ;;  %1730 = vst.msk [vmem:[%s3868_s3 + $0x688] sm:$0xff] %vm1521_vm1, %v1427_v27 }
 0x1a2   :  { %v1071_v28 = vpop.f32.mrf.mxu0  ;;  %v1431_v29 = vpop.f32.mrf.mxu1 }
 0x1a3   :  { %1611 = vst [vmem:[%s3868_s3 + $0x2d0] sm:$0xff] %v1071_v28  ;;  %1731 = vst [vmem:[%s3868_s3 + $0x690] sm:$0xff] %v1431_v29 }
 0x1a4   :  { %v1073_v30 = vpop.f32.mrf.mxu0  ;;  %v1433_v31 = vpop.f32.mrf.mxu1 }
 0x1a5   :  { %1612 = vst.msk [vmem:[%s3868_s3 + $0x2d8] sm:$0xff] %vm1521_vm1, %v1073_v30  ;;  %1732 = vst.msk [vmem:[%s3868_s3 + $0x698] sm:$0xff] %vm1521_vm1, %v1433_v31 }
 0x1a6   :  { %v1077_v32 = vpop.f32.mrf.mxu0  ;;  %v1437_v33 = vpop.f32.mrf.mxu1 }
 0x1a7   :  { %1613 = vst [vmem:[%s3868_s3 + $0x2e0] sm:$0xff] %v1077_v32  ;;  %1733 = vst [vmem:[%s3868_s3 + $0x6a0] sm:$0xff] %v1437_v33 }
 0x1a8   :  { %v1079_v34 = vpop.f32.mrf.mxu0  ;;  %v1439_v35 = vpop.f32.mrf.mxu1 }
 0x1a9   :  { %1614 = vst.msk [vmem:[%s3868_s3 + $0x2e8] sm:$0xff] %vm1521_vm1, %v1079_v34  ;;  %1734 = vst.msk [vmem:[%s3868_s3 + $0x6a8] sm:$0xff] %vm1521_vm1, %v1439_v35 }
 0x1aa   :  { %v1083_v36 = vpop.f32.mrf.mxu0  ;;  %v1443_v37 = vpop.f32.mrf.mxu1 }
 0x1ab   :  { %1615 = vst [vmem:[%s3868_s3 + $0x2f0] sm:$0xff] %v1083_v36  ;;  %1735 = vst [vmem:[%s3868_s3 + $0x6b0] sm:$0xff] %v1443_v37 }
 0x1ac   :  { %v1085_v38 = vpop.f32.mrf.mxu0  ;;  %v1445_v39 = vpop.f32.mrf.mxu1 }
 0x1ad   :  { %1616 = vst.msk [vmem:[%s3868_s3 + $0x2f8] sm:$0xff] %vm1521_vm1, %v1085_v38  ;;  %1736 = vst.msk [vmem:[%s3868_s3 + $0x6b8] sm:$0xff] %vm1521_vm1, %v1445_v39 }
 0x1ae   :  { %v1089_v40 = vpop.f32.mrf.mxu0  ;;  %v1449_v41 = vpop.f32.mrf.mxu1 }
 0x1af   :  { %1617 = vst [vmem:[%s3868_s3 + $0x300] sm:$0xff] %v1089_v40  ;;  %1737 = vst [vmem:[%s3868_s3 + $0x6c0] sm:$0xff] %v1449_v41 }
 0x1b0   :  { %v1091_v42 = vpop.f32.mrf.mxu0  ;;  %v1451_v43 = vpop.f32.mrf.mxu1 }
 0x1b1   :  { %1618 = vst.msk [vmem:[%s3868_s3 + $0x308] sm:$0xff] %vm1521_vm1, %v1091_v42  ;;  %1738 = vst.msk [vmem:[%s3868_s3 + $0x6c8] sm:$0xff] %vm1521_vm1, %v1451_v43 }
 0x1b2   :  { %v1095_v44 = vpop.f32.mrf.mxu0  ;;  %v1455_v45 = vpop.f32.mrf.mxu1 }
 0x1b3   :  { %1619 = vst [vmem:[%s3868_s3 + $0x310] sm:$0xff] %v1095_v44  ;;  %1739 = vst [vmem:[%s3868_s3 + $0x6d0] sm:$0xff] %v1455_v45 }
 0x1b4   :  { %v1097_v46 = vpop.f32.mrf.mxu0  ;;  %v1457_v47 = vpop.f32.mrf.mxu1 }
 0x1b5   :  { %1620 = vst.msk [vmem:[%s3868_s3 + $0x318] sm:$0xff] %vm1521_vm1, %v1097_v46  ;;  %1740 = vst.msk [vmem:[%s3868_s3 + $0x6d8] sm:$0xff] %vm1521_vm1, %v1457_v47 }
 0x1b6   :  { %v1101_v48 = vpop.f32.mrf.mxu0  ;;  %v1461_v49 = vpop.f32.mrf.mxu1 }
 0x1b7   :  { %1621 = vst [vmem:[%s3868_s3 + $0x320] sm:$0xff] %v1101_v48  ;;  %1741 = vst [vmem:[%s3868_s3 + $0x6e0] sm:$0xff] %v1461_v49 }
 0x1b8   :  { %v1103_v50 = vpop.f32.mrf.mxu0  ;;  %v1463_v51 = vpop.f32.mrf.mxu1 }
 0x1b9   :  { %1622 = vst.msk [vmem:[%s3868_s3 + $0x328] sm:$0xff] %vm1521_vm1, %v1103_v50  ;;  %1742 = vst.msk [vmem:[%s3868_s3 + $0x6e8] sm:$0xff] %vm1521_vm1, %v1463_v51 }
 0x1ba   :  { %v1107_v52 = vpop.f32.mrf.mxu0  ;;  %v1467_v53 = vpop.f32.mrf.mxu1 }
 0x1bb   :  { %1623 = vst [vmem:[%s3868_s3 + $0x330] sm:$0xff] %v1107_v52  ;;  %1743 = vst [vmem:[%s3868_s3 + $0x6f0] sm:$0xff] %v1467_v53 }
 0x1bc   :  { %v1109_v54 = vpop.f32.mrf.mxu0  ;;  %v1469_v55 = vpop.f32.mrf.mxu1 }
 0x1bd   :  { %1624 = vst.msk [vmem:[%s3868_s3 + $0x338] sm:$0xff] %vm1521_vm1, %v1109_v54  ;;  %1744 = vst.msk [vmem:[%s3868_s3 + $0x6f8] sm:$0xff] %vm1521_vm1, %v1469_v55 }
 0x1be   :  { %v1113_v56 = vpop.f32.mrf.mxu0  ;;  %v1473_v57 = vpop.f32.mrf.mxu1 }
 0x1bf   :  { %1625 = vst [vmem:[%s3868_s3 + $0x340] sm:$0xff] %v1113_v56  ;;  %1745 = vst [vmem:[%s3868_s3 + $0x700] sm:$0xff] %v1473_v57 }
 0x1c0   :  { %v1115_v58 = vpop.f32.mrf.mxu0  ;;  %v1475_v59 = vpop.f32.mrf.mxu1 }
 0x1c1   :  { %1626 = vst.msk [vmem:[%s3868_s3 + $0x348] sm:$0xff] %vm1521_vm1, %v1115_v58  ;;  %1746 = vst.msk [vmem:[%s3868_s3 + $0x708] sm:$0xff] %vm1521_vm1, %v1475_v59 }
 0x1c2   :  { %v1119_v60 = vpop.f32.mrf.mxu0  ;;  %v1479_v61 = vpop.f32.mrf.mxu1 }
 0x1c3   :  { %1627 = vst [vmem:[%s3868_s3 + $0x350] sm:$0xff] %v1119_v60  ;;  %1747 = vst [vmem:[%s3868_s3 + $0x710] sm:$0xff] %v1479_v61 }
 0x1c4   :  { %v1121_v62 = vpop.f32.mrf.mxu0  ;;  %v1481_v63 = vpop.f32.mrf.mxu1 }
 0x1c5   :  { %1628 = vst.msk [vmem:[%s3868_s3 + $0x358] sm:$0xff] %vm1521_vm1, %v1121_v62  ;;  %1748 = vst.msk [vmem:[%s3868_s3 + $0x718] sm:$0xff] %vm1521_vm1, %v1481_v63 }
 0x1c6   :  { %v1125_v0 = vpop.f32.mrf.mxu0  ;;  %v1485_v1 = vpop.f32.mrf.mxu1 }
 0x1c7   :  { %1629 = vst [vmem:[%s3868_s3 + $0x360] sm:$0xff] %v1125_v0  ;;  %1749 = vst [vmem:[%s3868_s3 + $0x720] sm:$0xff] %v1485_v1 }
 0x1c8   :  { %v1127_v2 = vpop.f32.mrf.mxu0  ;;  %v1487_v3 = vpop.f32.mrf.mxu1 }
 0x1c9   :  { %1630 = vst.msk [vmem:[%s3868_s3 + $0x368] sm:$0xff] %vm1521_vm1, %v1127_v2  ;;  %1750 = vst.msk [vmem:[%s3868_s3 + $0x728] sm:$0xff] %vm1521_vm1, %v1487_v3 }
 0x1ca   :  { %v1131_v4 = vpop.f32.mrf.mxu0  ;;  %v1491_v5 = vpop.f32.mrf.mxu1 }
 0x1cb   :  { %1631 = vst [vmem:[%s3868_s3 + $0x370] sm:$0xff] %v1131_v4  ;;  %1751 = vst [vmem:[%s3868_s3 + $0x730] sm:$0xff] %v1491_v5 }
 0x1cc   :  { %v1133_v6 = vpop.f32.mrf.mxu0  ;;  %v1493_v7 = vpop.f32.mrf.mxu1 }
 0x1cd   :  { %1632 = vst.msk [vmem:[%s3868_s3 + $0x378] sm:$0xff] %vm1521_vm1, %v1133_v6  ;;  %1752 = vst.msk [vmem:[%s3868_s3 + $0x738] sm:$0xff] %vm1521_vm1, %v1493_v7 }
 0x1ce   :  { %v1137_v8 = vpop.f32.mrf.mxu0  ;;  %v1497_v9 = vpop.f32.mrf.mxu1 }
 0x1cf   :  { %1633 = vst [vmem:[%s3868_s3 + $0x380] sm:$0xff] %v1137_v8  ;;  %1753 = vst [vmem:[%s3868_s3 + $0x740] sm:$0xff] %v1497_v9 }
 0x1d0   :  { %v1139_v10 = vpop.f32.mrf.mxu0  ;;  %v1499_v11 = vpop.f32.mrf.mxu1 }
 0x1d1   :  { %1634 = vst.msk [vmem:[%s3868_s3 + $0x388] sm:$0xff] %vm1521_vm1, %v1139_v10  ;;  %1754 = vst.msk [vmem:[%s3868_s3 + $0x748] sm:$0xff] %vm1521_vm1, %v1499_v11 }
 0x1d2   :  { %v1143_v12 = vpop.f32.mrf.mxu0  ;;  %v1503_v13 = vpop.f32.mrf.mxu1 }
 0x1d3   :  { %1635 = vst [vmem:[%s3868_s3 + $0x390] sm:$0xff] %v1143_v12  ;;  %1755 = vst [vmem:[%s3868_s3 + $0x750] sm:$0xff] %v1503_v13 }
 0x1d4   :  { %v1145_v14 = vpop.f32.mrf.mxu0  ;;  %v1505_v15 = vpop.f32.mrf.mxu1 }
 0x1d5   :  { %1636 = vst.msk [vmem:[%s3868_s3 + $0x398] sm:$0xff] %vm1521_vm1, %v1145_v14  ;;  %1756 = vst.msk [vmem:[%s3868_s3 + $0x758] sm:$0xff] %vm1521_vm1, %v1505_v15 }
 0x1d6   :  { %v1149_v16 = vpop.f32.mrf.mxu0  ;;  %v1509_v17 = vpop.f32.mrf.mxu1 }
 0x1d7   :  { %1637 = vst [vmem:[%s3868_s3 + $0x3a0] sm:$0xff] %v1149_v16  ;;  %1757 = vst [vmem:[%s3868_s3 + $0x760] sm:$0xff] %v1509_v17 }
 0x1d8   :  { %v1151_v18 = vpop.f32.mrf.mxu0  ;;  %v1511_v19 = vpop.f32.mrf.mxu1 }
 0x1d9   :  { %1638 = vst.msk [vmem:[%s3868_s3 + $0x3a8] sm:$0xff] %vm1521_vm1, %v1151_v18  ;;  %1758 = vst.msk [vmem:[%s3868_s3 + $0x768] sm:$0xff] %vm1521_vm1, %v1511_v19 }
 0x1da   :  { %v1155_v20 = vpop.f32.mrf.mxu0  ;;  %v1515_v21 = vpop.f32.mrf.mxu1 }
 0x1db   :  { %1639 = vst [vmem:[%s3868_s3 + $0x3b0] sm:$0xff] %v1155_v20  ;;  %1759 = vst [vmem:[%s3868_s3 + $0x770] sm:$0xff] %v1515_v21 }
 0x1dc   :  { %v1157_v22 = vpop.f32.mrf.mxu0  ;;  %v1517_v23 = vpop.f32.mrf.mxu1 }
 0x1dd   :  { %1640 = vst.msk [vmem:[%s3868_s3 + $0x3b8] sm:$0xff] %vm1521_vm1, %v1157_v22  ;;  %1760 = vst.msk [vmem:[%s3868_s3 + $0x778] sm:$0xff] %vm1521_vm1, %v1517_v23 }

</bundles_post_ra>
